<compile_context>
chip_gen: v6e
topology: v6e:2x2x1
jax: 0.10.0
libtpu: 0.0.40
codegen_flags: <defaults>
</compile_context>

<pallas_src>
import math

import jax
import jax.numpy as jnp
from jax.experimental import pallas as pl

# ---------------- small synthetic BERT config ----------------
BATCH = 2
SEQ = 8
HIDDEN = 32          # opt.bert_dim
NUM_HEADS = 2
HEAD_DIM = HIDDEN // NUM_HEADS
INTER = 64           # FFN intermediate size
NUM_LAYERS = 2
VOCAB = 30
MAX_POS = 16
NUM_TYPES = 2
NUM_RATINGS = 5
RATING_PAD = 128     # lane-dense padded width for the rating output store
LN_EPS = 1e-12


# ---------------- in-kernel helpers ----------------
def _layernorm(x, gamma, beta, eps=LN_EPS):
    mu = jnp.mean(x, axis=-1, keepdims=True)
    var = jnp.mean((x - mu) ** 2, axis=-1, keepdims=True)
    return (x - mu) * jax.lax.rsqrt(var + eps) * gamma + beta


def _gelu(x):
    # TODO(synk): PyTorch F.gelu default is the erf variant; tanh approx differs by <1e-3.
    return jax.nn.gelu(x, approximate=True)


# ---------------- fused Pallas kernel ----------------
def bert_rating_kernel(emb_ref, embg_ref, embb_ref,
                       wqkv_ref, bqkv_ref, wo_ref, bo_ref, ln1g_ref, ln1b_ref,
                       wi_ref, bi_ref, wf_ref, bf_ref, ln2g_ref, ln2b_ref,
                       wp_ref, bp_ref, wr_ref, br_ref,
                       out_ref):
    """Embedding LN + NUM_LAYERS encoder layers + pooler + rating head, all in VMEM."""
    B, S, H = emb_ref.shape
    N = B * S

    # Batch folded onto sublanes: all dense matmuls operate on a single (B*S, H) block.
    x = emb_ref[...].astype(jnp.float32).reshape(N, H)
    x = _layernorm(x, embg_ref[...], embb_ref[...])

    scale = 1.0 / math.sqrt(HEAD_DIM)
    for l in range(NUM_LAYERS):                           # static unroll, weights VMEM-resident
        # Hoist per-layer weights/biases once (no re-reads inside the head loop).
        wqkv = wqkv_ref[l]                                # (H, 3H)
        bqkv = bqkv_ref[l]                                # (1, 3H)
        wo, bo = wo_ref[l], bo_ref[l]
        ln1g, ln1b = ln1g_ref[l], ln1b_ref[l]
        wi, bi = wi_ref[l], bi_ref[l]
        wf, bf = wf_ref[l], bf_ref[l]
        ln2g, ln2b = ln2g_ref[l], ln2b_ref[l]

        # Fused QKV projection: one MXU push instead of three.
        qkv = jnp.dot(x, wqkv, preferred_element_type=jnp.float32) + bqkv   # (N, 3H)
        q = qkv[:, 0 * H:1 * H].reshape(B, S, H)
        k = qkv[:, 1 * H:2 * H].reshape(B, S, H)
        v = qkv[:, 2 * H:3 * H].reshape(B, S, H)

        # Self-attention (all-ones mask, matching self.bert(indices) defaults).
        # TODO(synk): fully head-batched einsum needs a (B,S,nh,hd)->(B,nh,S,hd) transpose
        # with no guaranteed Mosaic lowering at these sub-tile shapes; static head loop kept,
        # but the head concat is eliminated by folding ctx_h through Wo rows.
        attn = jnp.zeros((N, H), jnp.float32)
        for h in range(NUM_HEADS):                        # static loop
            lo, hi = h * HEAD_DIM, (h + 1) * HEAD_DIM
            qh, kh, vh = q[..., lo:hi], k[..., lo:hi], v[..., lo:hi]          # (B, S, hd)
            s = jnp.einsum('bqd,bkd->bqk', qh, kh,
                           preferred_element_type=jnp.float32) * scale       # (B, S, S)
            s = s - jnp.max(s, axis=-1, keepdims=True)
            p = jnp.exp(s)
            p = p * pl.reciprocal(jnp.sum(p, axis=-1, keepdims=True), approx=True)
            ctx = jnp.einsum('bqk,bkd->bqd', p, vh,
                             preferred_element_type=jnp.float32)              # (B, S, hd)
            attn = attn + jnp.dot(ctx.reshape(N, HEAD_DIM), wo[lo:hi, :],
                                  preferred_element_type=jnp.float32)
        attn = attn + bo
        x = _layernorm(x + attn, ln1g, ln1b)

        # Feed-forward.
        inter = _gelu(jnp.dot(x, wi, preferred_element_type=jnp.float32) + bi)
        ffn = jnp.dot(inter, wf, preferred_element_type=jnp.float32) + bf
        x = _layernorm(x + ffn, ln2g, ln2b)

    # Pooler on the [CLS] token of each sequence (rows 0, S, 2S, ... of the flat block).
    cls = jnp.concatenate([x[b * S:b * S + 1, :] for b in range(B)], axis=0)  # (B, H)
    pooled = jnp.tanh(jnp.dot(cls, wp_ref[...],
                              preferred_element_type=jnp.float32) + bp_ref[...])
    # nn.Dropout(opt.dropout) is identity at inference (eval mode).
    rating = jnp.dot(pooled, wr_ref[...],
                     preferred_element_type=jnp.float32) + br_ref[...]        # (B, 128)
    out_ref[...] = rating.astype(out_ref.dtype)                               # lane-dense store


# ---------------- parameter init (deterministic, synthetic) ----------------
def init_params(key):
    def dense(k, fan_in, fan_out):
        kw, kb = jax.random.split(k)
        w = jax.random.normal(kw, (fan_in, fan_out), jnp.float32) * 0.02
        b = jax.random.normal(kb, (1, fan_out), jnp.float32) * 0.02
        return w, b

    keys = jax.random.split(key, 4 + NUM_LAYERS)
    params = {
        "word_emb": jax.random.normal(keys[0], (VOCAB, HIDDEN), jnp.float32) * 0.02,
        "pos_emb": jax.random.normal(keys[1], (MAX_POS, HIDDEN), jnp.float32) * 0.02,
        "type_emb": jax.random.normal(keys[2], (NUM_TYPES, HIDDEN), jnp.float32) * 0.02,
        "emb_ln_g": jnp.ones((1, HIDDEN), jnp.float32),
        "emb_ln_b": jnp.zeros((1, HIDDEN), jnp.float32),
    }

    stacks = {n: [] for n in ("wqkv", "bqkv", "wo", "bo", "ln1_g", "ln1_b",
                              "wi", "bi", "wf", "bf", "ln2_g", "ln2_b")}
    for li in range(NUM_LAYERS):
        lk = jax.random.split(keys[3 + li], 6)
        wq, bq = dense(lk[0], HIDDEN, HIDDEN)
        wk, bk = dense(lk[1], HIDDEN, HIDDEN)
        wv, bv = dense(lk[2], HIDDEN, HIDDEN)
        wo, bo = dense(lk[3], HIDDEN, HIDDEN)
        wi, bi = dense(lk[4], HIDDEN, INTER)
        wf, bf = dense(lk[5], INTER, HIDDEN)
        stacks["wqkv"].append(jnp.concatenate([wq, wk, wv], axis=1))   # (H, 3H)
        stacks["bqkv"].append(jnp.concatenate([bq, bk, bv], axis=1))   # (1, 3H)
        stacks["wo"].append(wo); stacks["bo"].append(bo)
        stacks["ln1_g"].append(jnp.ones((1, HIDDEN), jnp.float32))
        stacks["ln1_b"].append(jnp.zeros((1, HIDDEN), jnp.float32))
        stacks["wi"].append(wi); stacks["bi"].append(bi)
        stacks["wf"].append(wf); stacks["bf"].append(bf)
        stacks["ln2_g"].append(jnp.ones((1, HIDDEN), jnp.float32))
        stacks["ln2_b"].append(jnp.zeros((1, HIDDEN), jnp.float32))
    for n, vals in stacks.items():
        params[n] = jnp.stack(vals, axis=0)                            # (L, ...)

    hk = jax.random.split(keys[3 + NUM_LAYERS], 2)
    params["pooler_w"], params["pooler_b"] = dense(hk[0], HIDDEN, HIDDEN)
    wr, br = dense(hk[1], HIDDEN, NUM_RATINGS)
    # Zero-pad rating head to 128 output lanes so the kernel store is lane-dense.
    params["rating_w"] = jnp.pad(wr, ((0, 0), (0, RATING_PAD - NUM_RATINGS)))
    params["rating_b"] = jnp.pad(br, ((0, 0), (0, RATING_PAD - NUM_RATINGS)))
    return params


# ---------------- full forward (PretrainBERT.forward) ----------------
@jax.jit
def pretrain_bert_forward(params, text_bert_indices):
    B, S = text_bert_indices.shape
    # Embedding lookups (data-dependent gathers) stay in plain JAX glue.
    emb = (params["word_emb"][text_bert_indices]
           + params["pos_emb"][:S][None, :, :]
           + params["type_emb"][0][None, None, :])

    rating_padded = pl.pallas_call(
        bert_rating_kernel,
        out_shape=jax.ShapeDtypeStruct((B, RATING_PAD), jnp.float32),
    )(emb, params["emb_ln_g"], params["emb_ln_b"],
      params["wqkv"], params["bqkv"], params["wo"], params["bo"],
      params["ln1_g"], params["ln1_b"],
      params["wi"], params["bi"], params["wf"], params["bf"],
      params["ln2_g"], params["ln2_b"],
      params["pooler_w"], params["pooler_b"],
      params["rating_w"], params["rating_b"])

    return rating_padded[:, :NUM_RATINGS]


if __name__ == "__main__":
    key = jax.random.PRNGKey(0)
    pkey, ikey = jax.random.split(key)
    params = init_params(pkey)
    text_bert_indices = jax.random.randint(ikey, (BATCH, SEQ), 0, VOCAB, dtype=jnp.int32)

    rating = pretrain_bert_forward(params, text_bert_indices)
    rating = jax.block_until_ready(rating)
    assert rating.shape == (BATCH, NUM_RATINGS) and rating.dtype == jnp.float32
    assert bool(jnp.all(jnp.isfinite(rating)))
    print("KERNEL_OK")
</pallas_src>

<mosaic_0001>
module attributes {stable_mosaic.version = 11 : i64} {
  func.func @bert_rating_kernel(%arg0: memref<2x8x32xf32, #tpu.memory_space<vmem>>, %arg1: memref<1x32xf32, #tpu.memory_space<vmem>>, %arg2: memref<1x32xf32, #tpu.memory_space<vmem>>, %arg3: memref<2x32x96xf32, #tpu.memory_space<vmem>>, %arg4: memref<2x1x96xf32, #tpu.memory_space<vmem>>, %arg5: memref<2x32x32xf32, #tpu.memory_space<vmem>>, %arg6: memref<2x1x32xf32, #tpu.memory_space<vmem>>, %arg7: memref<2x1x32xf32, #tpu.memory_space<vmem>>, %arg8: memref<2x1x32xf32, #tpu.memory_space<vmem>>, %arg9: memref<2x32x64xf32, #tpu.memory_space<vmem>>, %arg10: memref<2x1x64xf32, #tpu.memory_space<vmem>>, %arg11: memref<2x64x32xf32, #tpu.memory_space<vmem>>, %arg12: memref<2x1x32xf32, #tpu.memory_space<vmem>>, %arg13: memref<2x1x32xf32, #tpu.memory_space<vmem>>, %arg14: memref<2x1x32xf32, #tpu.memory_space<vmem>>, %arg15: memref<32x32xf32, #tpu.memory_space<vmem>>, %arg16: memref<1x32xf32, #tpu.memory_space<vmem>>, %arg17: memref<32x128xf32, #tpu.memory_space<vmem>>, %arg18: memref<1x128xf32, #tpu.memory_space<vmem>>, %arg19: memref<2x128xf32, #tpu.memory_space<vmem>>) attributes {dimension_semantics = [], scalar_prefetch = 0 : i64, scratch_operands = 0 : i64, tpu.core_type = #tpu.core_type<tc>} {
    %c0 = arith.constant 0 : index
    %c0_0 = arith.constant 0 : index
    %c0_1 = arith.constant 0 : index
    %0 = vector.load %arg0[%c0, %c0_0, %c0_1] : memref<2x8x32xf32, #tpu.memory_space<vmem>>, vector<2x8x32xf32>
    %1 = vector.shape_cast %0 : vector<2x8x32xf32> to vector<16x32xf32>
    %c0_2 = arith.constant 0 : index
    %c0_3 = arith.constant 0 : index
    %2 = vector.load %arg1[%c0_2, %c0_3] : memref<1x32xf32, #tpu.memory_space<vmem>>, vector<1x32xf32>
    %c0_4 = arith.constant 0 : index
    %c0_5 = arith.constant 0 : index
    %3 = vector.load %arg2[%c0_4, %c0_5] : memref<1x32xf32, #tpu.memory_space<vmem>>, vector<1x32xf32>
    %cst = arith.constant dense<0.000000e+00> : vector<16xf32>
    %4 = vector.multi_reduction <add>, %1, %cst [1] : vector<16x32xf32> to vector<16xf32>
    %5 = vector.shape_cast %4 : vector<16xf32> to vector<16x1xf32>
    %cst_6 = arith.constant 3.200000e+01 : f32
    %6 = vector.broadcast %cst_6 : f32 to vector<16x1xf32>
    %7 = arith.divf %5, %6 : vector<16x1xf32>
    %8 = vector.broadcast %7 : vector<16x1xf32> to vector<16x32xf32>
    %9 = arith.subf %1, %8 : vector<16x32xf32>
    %10 = arith.mulf %9, %9 : vector<16x32xf32>
    %cst_7 = arith.constant dense<0.000000e+00> : vector<16xf32>
    %11 = vector.multi_reduction <add>, %10, %cst_7 [1] : vector<16x32xf32> to vector<16xf32>
    %12 = vector.shape_cast %11 : vector<16xf32> to vector<16x1xf32>
    %cst_8 = arith.constant 3.200000e+01 : f32
    %13 = vector.broadcast %cst_8 : f32 to vector<16x1xf32>
    %14 = arith.divf %12, %13 : vector<16x1xf32>
    %15 = vector.broadcast %7 : vector<16x1xf32> to vector<16x32xf32>
    %16 = arith.subf %1, %15 : vector<16x32xf32>
    %cst_9 = arith.constant 9.99999996E-13 : f32
    %17 = vector.broadcast %cst_9 : f32 to vector<16x1xf32>
    %18 = arith.addf %14, %17 : vector<16x1xf32>
    %19 = math.rsqrt %18 : vector<16x1xf32>
    %20 = vector.broadcast %19 : vector<16x1xf32> to vector<16x32xf32>
    %21 = arith.mulf %16, %20 : vector<16x32xf32>
    %22 = vector.broadcast %2 : vector<1x32xf32> to vector<16x32xf32>
    %23 = arith.mulf %21, %22 : vector<16x32xf32>
    %24 = vector.broadcast %3 : vector<1x32xf32> to vector<16x32xf32>
    %25 = arith.addf %23, %24 : vector<16x32xf32>
    %c0_10 = arith.constant 0 : index
    %c0_11 = arith.constant 0 : index
    %c0_12 = arith.constant 0 : index
    %26 = vector.load %arg3[%c0_10, %c0_11, %c0_12] : memref<2x32x96xf32, #tpu.memory_space<vmem>>, vector<1x32x96xf32>
    %27 = vector.shape_cast %26 : vector<1x32x96xf32> to vector<32x96xf32>
    %c0_13 = arith.constant 0 : index
    %c0_14 = arith.constant 0 : index
    %c0_15 = arith.constant 0 : index
    %28 = vector.load %arg4[%c0_13, %c0_14, %c0_15] : memref<2x1x96xf32, #tpu.memory_space<vmem>>, vector<1x1x96xf32>
    %29 = vector.shape_cast %28 : vector<1x1x96xf32> to vector<1x96xf32>
    %c0_16 = arith.constant 0 : index
    %c0_17 = arith.constant 0 : index
    %c0_18 = arith.constant 0 : index
    %30 = vector.load %arg5[%c0_16, %c0_17, %c0_18] : memref<2x32x32xf32, #tpu.memory_space<vmem>>, vector<1x32x32xf32>
    %31 = vector.shape_cast %30 : vector<1x32x32xf32> to vector<32x32xf32>
    %c0_19 = arith.constant 0 : index
    %c0_20 = arith.constant 0 : index
    %c0_21 = arith.constant 0 : index
    %32 = vector.load %arg6[%c0_19, %c0_20, %c0_21] : memref<2x1x32xf32, #tpu.memory_space<vmem>>, vector<1x1x32xf32>
    %33 = vector.shape_cast %32 : vector<1x1x32xf32> to vector<1x32xf32>
    %c0_22 = arith.constant 0 : index
    %c0_23 = arith.constant 0 : index
    %c0_24 = arith.constant 0 : index
    %34 = vector.load %arg7[%c0_22, %c0_23, %c0_24] : memref<2x1x32xf32, #tpu.memory_space<vmem>>, vector<1x1x32xf32>
    %35 = vector.shape_cast %34 : vector<1x1x32xf32> to vector<1x32xf32>
    %c0_25 = arith.constant 0 : index
    %c0_26 = arith.constant 0 : index
    %c0_27 = arith.constant 0 : index
    %36 = vector.load %arg8[%c0_25, %c0_26, %c0_27] : memref<2x1x32xf32, #tpu.memory_space<vmem>>, vector<1x1x32xf32>
    %37 = vector.shape_cast %36 : vector<1x1x32xf32> to vector<1x32xf32>
    %c0_28 = arith.constant 0 : index
    %c0_29 = arith.constant 0 : index
    %c0_30 = arith.constant 0 : index
    %38 = vector.load %arg9[%c0_28, %c0_29, %c0_30] : memref<2x32x64xf32, #tpu.memory_space<vmem>>, vector<1x32x64xf32>
    %39 = vector.shape_cast %38 : vector<1x32x64xf32> to vector<32x64xf32>
    %c0_31 = arith.constant 0 : index
    %c0_32 = arith.constant 0 : index
    %c0_33 = arith.constant 0 : index
    %40 = vector.load %arg10[%c0_31, %c0_32, %c0_33] : memref<2x1x64xf32, #tpu.memory_space<vmem>>, vector<1x1x64xf32>
    %41 = vector.shape_cast %40 : vector<1x1x64xf32> to vector<1x64xf32>
    %c0_34 = arith.constant 0 : index
    %c0_35 = arith.constant 0 : index
    %c0_36 = arith.constant 0 : index
    %42 = vector.load %arg11[%c0_34, %c0_35, %c0_36] : memref<2x64x32xf32, #tpu.memory_space<vmem>>, vector<1x64x32xf32>
    %43 = vector.shape_cast %42 : vector<1x64x32xf32> to vector<64x32xf32>
    %c0_37 = arith.constant 0 : index
    %c0_38 = arith.constant 0 : index
    %c0_39 = arith.constant 0 : index
    %44 = vector.load %arg12[%c0_37, %c0_38, %c0_39] : memref<2x1x32xf32, #tpu.memory_space<vmem>>, vector<1x1x32xf32>
    %45 = vector.shape_cast %44 : vector<1x1x32xf32> to vector<1x32xf32>
    %c0_40 = arith.constant 0 : index
    %c0_41 = arith.constant 0 : index
    %c0_42 = arith.constant 0 : index
    %46 = vector.load %arg13[%c0_40, %c0_41, %c0_42] : memref<2x1x32xf32, #tpu.memory_space<vmem>>, vector<1x1x32xf32>
    %47 = vector.shape_cast %46 : vector<1x1x32xf32> to vector<1x32xf32>
    %c0_43 = arith.constant 0 : index
    %c0_44 = arith.constant 0 : index
    %c0_45 = arith.constant 0 : index
    %48 = vector.load %arg14[%c0_43, %c0_44, %c0_45] : memref<2x1x32xf32, #tpu.memory_space<vmem>>, vector<1x1x32xf32>
    %49 = vector.shape_cast %48 : vector<1x1x32xf32> to vector<1x32xf32>
    %cst_46 = arith.constant dense<0.000000e+00> : vector<16x96xf32>
    %50 = tpu.matmul %25, %27, %cst_46 {dimension_numbers = #tpu.dot_dimension_numbers<[1], [0], [0], [1], [0, 0, 1, 1], [], []>} : vector<16x32xf32>, vector<32x96xf32>, vector<16x96xf32> -> vector<16x96xf32>
    %51 = vector.broadcast %29 : vector<1x96xf32> to vector<16x96xf32>
    %52 = arith.addf %50, %51 : vector<16x96xf32>
    %53 = vector.extract_strided_slice %52 {offsets = [0, 0], sizes = [16, 32], strides = [1, 1]} : vector<16x96xf32> to vector<16x32xf32>
    %54 = vector.shape_cast %53 : vector<16x32xf32> to vector<2x8x32xf32>
    %55 = vector.extract_strided_slice %52 {offsets = [0, 32], sizes = [16, 32], strides = [1, 1]} : vector<16x96xf32> to vector<16x32xf32>
    %56 = vector.shape_cast %55 : vector<16x32xf32> to vector<2x8x32xf32>
    %57 = vector.extract_strided_slice %52 {offsets = [0, 64], sizes = [16, 32], strides = [1, 1]} : vector<16x96xf32> to vector<16x32xf32>
    %58 = vector.shape_cast %57 : vector<16x32xf32> to vector<2x8x32xf32>
    %cst_47 = arith.constant 0.000000e+00 : f32
    %59 = vector.broadcast %cst_47 : f32 to vector<16x32xf32>
    %60 = vector.extract_strided_slice %54 {offsets = [0, 0, 0], sizes = [2, 8, 16], strides = [1, 1, 1]} : vector<2x8x32xf32> to vector<2x8x16xf32>
    %61 = vector.extract_strided_slice %56 {offsets = [0, 0, 0], sizes = [2, 8, 16], strides = [1, 1, 1]} : vector<2x8x32xf32> to vector<2x8x16xf32>
    %62 = vector.extract_strided_slice %58 {offsets = [0, 0, 0], sizes = [2, 8, 16], strides = [1, 1, 1]} : vector<2x8x32xf32> to vector<2x8x16xf32>
    "tpu.trace_start"() <{level = 10 : i32, message = "bqd,bkd->bqk"}> : () -> ()
    %cst_48 = arith.constant dense<0.000000e+00> : vector<2x8x8xf32>
    %63 = tpu.matmul %60, %61, %cst_48 {dimension_numbers = #tpu.dot_dimension_numbers<[2], [2], [1], [1], [0, 0, 0, 1, 1, 1], [0], [0]>} : vector<2x8x16xf32>, vector<2x8x16xf32>, vector<2x8x8xf32> -> vector<2x8x8xf32>
    "tpu.trace_stop"() : () -> ()
    %cst_49 = arith.constant 2.500000e-01 : f32
    %64 = vector.broadcast %cst_49 : f32 to vector<2x8x8xf32>
    %65 = arith.mulf %63, %64 : vector<2x8x8xf32>
    %cst_50 = arith.constant dense<0xFF800000> : vector<2x8xf32>
    %66 = vector.multi_reduction <maximumf>, %65, %cst_50 [2] : vector<2x8x8xf32> to vector<2x8xf32>
    %67 = vector.shape_cast %66 : vector<2x8xf32> to vector<2x8x1xf32>
    %68 = vector.broadcast %67 : vector<2x8x1xf32> to vector<2x8x8xf32>
    %69 = arith.subf %65, %68 : vector<2x8x8xf32>
    %70 = math.exp %69 : vector<2x8x8xf32>
    %cst_51 = arith.constant dense<0.000000e+00> : vector<2x8xf32>
    %71 = vector.multi_reduction <add>, %70, %cst_51 [2] : vector<2x8x8xf32> to vector<2x8xf32>
    %72 = vector.shape_cast %71 : vector<2x8xf32> to vector<2x8x1xf32>
    %73 = tpu.reciprocal %72 {approx = true} : vector<2x8x1xf32> -> vector<2x8x1xf32>
    %74 = vector.broadcast %73 : vector<2x8x1xf32> to vector<2x8x8xf32>
    %75 = arith.mulf %70, %74 : vector<2x8x8xf32>
    "tpu.trace_start"() <{level = 10 : i32, message = "bqk,bkd->bqd"}> : () -> ()
    %cst_52 = arith.constant dense<0.000000e+00> : vector<2x8x16xf32>
    %76 = tpu.matmul %75, %62, %cst_52 {dimension_numbers = #tpu.dot_dimension_numbers<[2], [1], [1], [2], [0, 0, 0, 1, 1, 2], [0], [0]>} : vector<2x8x8xf32>, vector<2x8x16xf32>, vector<2x8x16xf32> -> vector<2x8x16xf32>
    "tpu.trace_stop"() : () -> ()
    %77 = vector.shape_cast %76 : vector<2x8x16xf32> to vector<16x16xf32>
    %78 = vector.extract_strided_slice %31 {offsets = [0, 0], sizes = [16, 32], strides = [1, 1]} : vector<32x32xf32> to vector<16x32xf32>
    %cst_53 = arith.constant dense<0.000000e+00> : vector<16x32xf32>
    %79 = tpu.matmul %77, %78, %cst_53 {dimension_numbers = #tpu.dot_dimension_numbers<[1], [0], [0], [1], [0, 0, 1, 1], [], []>} : vector<16x16xf32>, vector<16x32xf32>, vector<16x32xf32> -> vector<16x32xf32>
    %80 = arith.addf %59, %79 : vector<16x32xf32>
    %81 = vector.extract_strided_slice %54 {offsets = [0, 0, 16], sizes = [2, 8, 16], strides = [1, 1, 1]} : vector<2x8x32xf32> to vector<2x8x16xf32>
    %82 = vector.extract_strided_slice %56 {offsets = [0, 0, 16], sizes = [2, 8, 16], strides = [1, 1, 1]} : vector<2x8x32xf32> to vector<2x8x16xf32>
    %83 = vector.extract_strided_slice %58 {offsets = [0, 0, 16], sizes = [2, 8, 16], strides = [1, 1, 1]} : vector<2x8x32xf32> to vector<2x8x16xf32>
    "tpu.trace_start"() <{level = 10 : i32, message = "bqd,bkd->bqk"}> : () -> ()
    %cst_54 = arith.constant dense<0.000000e+00> : vector<2x8x8xf32>
    %84 = tpu.matmul %81, %82, %cst_54 {dimension_numbers = #tpu.dot_dimension_numbers<[2], [2], [1], [1], [0, 0, 0, 1, 1, 1], [0], [0]>} : vector<2x8x16xf32>, vector<2x8x16xf32>, vector<2x8x8xf32> -> vector<2x8x8xf32>
    "tpu.trace_stop"() : () -> ()
    %cst_55 = arith.constant 2.500000e-01 : f32
    %85 = vector.broadcast %cst_55 : f32 to vector<2x8x8xf32>
    %86 = arith.mulf %84, %85 : vector<2x8x8xf32>
    %cst_56 = arith.constant dense<0xFF800000> : vector<2x8xf32>
    %87 = vector.multi_reduction <maximumf>, %86, %cst_56 [2] : vector<2x8x8xf32> to vector<2x8xf32>
    %88 = vector.shape_cast %87 : vector<2x8xf32> to vector<2x8x1xf32>
    %89 = vector.broadcast %88 : vector<2x8x1xf32> to vector<2x8x8xf32>
    %90 = arith.subf %86, %89 : vector<2x8x8xf32>
    %91 = math.exp %90 : vector<2x8x8xf32>
    %cst_57 = arith.constant dense<0.000000e+00> : vector<2x8xf32>
    %92 = vector.multi_reduction <add>, %91, %cst_57 [2] : vector<2x8x8xf32> to vector<2x8xf32>
    %93 = vector.shape_cast %92 : vector<2x8xf32> to vector<2x8x1xf32>
    %94 = tpu.reciprocal %93 {approx = true} : vector<2x8x1xf32> -> vector<2x8x1xf32>
    %95 = vector.broadcast %94 : vector<2x8x1xf32> to vector<2x8x8xf32>
    %96 = arith.mulf %91, %95 : vector<2x8x8xf32>
    "tpu.trace_start"() <{level = 10 : i32, message = "bqk,bkd->bqd"}> : () -> ()
    %cst_58 = arith.constant dense<0.000000e+00> : vector<2x8x16xf32>
    %97 = tpu.matmul %96, %83, %cst_58 {dimension_numbers = #tpu.dot_dimension_numbers<[2], [1], [1], [2], [0, 0, 0, 1, 1, 2], [0], [0]>} : vector<2x8x8xf32>, vector<2x8x16xf32>, vector<2x8x16xf32> -> vector<2x8x16xf32>
    "tpu.trace_stop"() : () -> ()
    %98 = vector.shape_cast %97 : vector<2x8x16xf32> to vector<16x16xf32>
    %99 = vector.extract_strided_slice %31 {offsets = [16, 0], sizes = [16, 32], strides = [1, 1]} : vector<32x32xf32> to vector<16x32xf32>
    %cst_59 = arith.constant dense<0.000000e+00> : vector<16x32xf32>
    %100 = tpu.matmul %98, %99, %cst_59 {dimension_numbers = #tpu.dot_dimension_numbers<[1], [0], [0], [1], [0, 0, 1, 1], [], []>} : vector<16x16xf32>, vector<16x32xf32>, vector<16x32xf32> -> vector<16x32xf32>
    %101 = arith.addf %80, %100 : vector<16x32xf32>
    %102 = vector.broadcast %33 : vector<1x32xf32> to vector<16x32xf32>
    %103 = arith.addf %101, %102 : vector<16x32xf32>
    %104 = arith.addf %25, %103 : vector<16x32xf32>
    %cst_60 = arith.constant dense<0.000000e+00> : vector<16xf32>
    %105 = vector.multi_reduction <add>, %104, %cst_60 [1] : vector<16x32xf32> to vector<16xf32>
    %106 = vector.shape_cast %105 : vector<16xf32> to vector<16x1xf32>
    %cst_61 = arith.constant 3.200000e+01 : f32
    %107 = vector.broadcast %cst_61 : f32 to vector<16x1xf32>
    %108 = arith.divf %106, %107 : vector<16x1xf32>
    %109 = vector.broadcast %108 : vector<16x1xf32> to vector<16x32xf32>
    %110 = arith.subf %104, %109 : vector<16x32xf32>
    %111 = arith.mulf %110, %110 : vector<16x32xf32>
    %cst_62 = arith.constant dense<0.000000e+00> : vector<16xf32>
    %112 = vector.multi_reduction <add>, %111, %cst_62 [1] : vector<16x32xf32> to vector<16xf32>
    %113 = vector.shape_cast %112 : vector<16xf32> to vector<16x1xf32>
    %cst_63 = arith.constant 3.200000e+01 : f32
    %114 = vector.broadcast %cst_63 : f32 to vector<16x1xf32>
    %115 = arith.divf %113, %114 : vector<16x1xf32>
    %116 = vector.broadcast %108 : vector<16x1xf32> to vector<16x32xf32>
    %117 = arith.subf %104, %116 : vector<16x32xf32>
    %cst_64 = arith.constant 9.99999996E-13 : f32
    %118 = vector.broadcast %cst_64 : f32 to vector<16x1xf32>
    %119 = arith.addf %115, %118 : vector<16x1xf32>
    %120 = math.rsqrt %119 : vector<16x1xf32>
    %121 = vector.broadcast %120 : vector<16x1xf32> to vector<16x32xf32>
    %122 = arith.mulf %117, %121 : vector<16x32xf32>
    %123 = vector.broadcast %35 : vector<1x32xf32> to vector<16x32xf32>
    %124 = arith.mulf %122, %123 : vector<16x32xf32>
    %125 = vector.broadcast %37 : vector<1x32xf32> to vector<16x32xf32>
    %126 = arith.addf %124, %125 : vector<16x32xf32>
    %cst_65 = arith.constant dense<0.000000e+00> : vector<16x64xf32>
    %127 = tpu.matmul %126, %39, %cst_65 {dimension_numbers = #tpu.dot_dimension_numbers<[1], [0], [0], [1], [0, 0, 1, 1], [], []>} : vector<16x32xf32>, vector<32x64xf32>, vector<16x64xf32> -> vector<16x64xf32>
    %128 = vector.broadcast %41 : vector<1x64xf32> to vector<16x64xf32>
    %129 = arith.addf %127, %128 : vector<16x64xf32>
    %130 = arith.mulf %129, %129 : vector<16x64xf32>
    %131 = arith.mulf %129, %130 : vector<16x64xf32>
    %cst_66 = arith.constant 4.471500e-02 : f32
    %132 = vector.broadcast %cst_66 : f32 to vector<16x64xf32>
    %133 = arith.mulf %132, %131 : vector<16x64xf32>
    %134 = arith.addf %129, %133 : vector<16x64xf32>
    %cst_67 = arith.constant 0.797884583 : f32
    %135 = vector.broadcast %cst_67 : f32 to vector<16x64xf32>
    %136 = arith.mulf %135, %134 : vector<16x64xf32>
    %137 = math.tanh %136 : vector<16x64xf32>
    %cst_68 = arith.constant 1.000000e+00 : f32
    %138 = vector.broadcast %cst_68 : f32 to vector<16x64xf32>
    %139 = arith.addf %138, %137 : vector<16x64xf32>
    %cst_69 = arith.constant 5.000000e-01 : f32
    %140 = vector.broadcast %cst_69 : f32 to vector<16x64xf32>
    %141 = arith.mulf %140, %139 : vector<16x64xf32>
    %142 = arith.mulf %129, %141 : vector<16x64xf32>
    %cst_70 = arith.constant dense<0.000000e+00> : vector<16x32xf32>
    %143 = tpu.matmul %142, %43, %cst_70 {dimension_numbers = #tpu.dot_dimension_numbers<[1], [0], [0], [1], [0, 0, 1, 1], [], []>} : vector<16x64xf32>, vector<64x32xf32>, vector<16x32xf32> -> vector<16x32xf32>
    %144 = vector.broadcast %45 : vector<1x32xf32> to vector<16x32xf32>
    %145 = arith.addf %143, %144 : vector<16x32xf32>
    %146 = arith.addf %126, %145 : vector<16x32xf32>
    %cst_71 = arith.constant dense<0.000000e+00> : vector<16xf32>
    %147 = vector.multi_reduction <add>, %146, %cst_71 [1] : vector<16x32xf32> to vector<16xf32>
    %148 = vector.shape_cast %147 : vector<16xf32> to vector<16x1xf32>
    %cst_72 = arith.constant 3.200000e+01 : f32
    %149 = vector.broadcast %cst_72 : f32 to vector<16x1xf32>
    %150 = arith.divf %148, %149 : vector<16x1xf32>
    %151 = vector.broadcast %150 : vector<16x1xf32> to vector<16x32xf32>
    %152 = arith.subf %146, %151 : vector<16x32xf32>
    %153 = arith.mulf %152, %152 : vector<16x32xf32>
    %cst_73 = arith.constant dense<0.000000e+00> : vector<16xf32>
    %154 = vector.multi_reduction <add>, %153, %cst_73 [1] : vector<16x32xf32> to vector<16xf32>
    %155 = vector.shape_cast %154 : vector<16xf32> to vector<16x1xf32>
    %cst_74 = arith.constant 3.200000e+01 : f32
    %156 = vector.broadcast %cst_74 : f32 to vector<16x1xf32>
    %157 = arith.divf %155, %156 : vector<16x1xf32>
    %158 = vector.broadcast %150 : vector<16x1xf32> to vector<16x32xf32>
    %159 = arith.subf %146, %158 : vector<16x32xf32>
    %cst_75 = arith.constant 9.99999996E-13 : f32
    %160 = vector.broadcast %cst_75 : f32 to vector<16x1xf32>
    %161 = arith.addf %157, %160 : vector<16x1xf32>
    %162 = math.rsqrt %161 : vector<16x1xf32>
    %163 = vector.broadcast %162 : vector<16x1xf32> to vector<16x32xf32>
    %164 = arith.mulf %159, %163 : vector<16x32xf32>
    %165 = vector.broadcast %47 : vector<1x32xf32> to vector<16x32xf32>
    %166 = arith.mulf %164, %165 : vector<16x32xf32>
    %167 = vector.broadcast %49 : vector<1x32xf32> to vector<16x32xf32>
    %168 = arith.addf %166, %167 : vector<16x32xf32>
    %c1 = arith.constant 1 : index
    %c0_76 = arith.constant 0 : index
    %c0_77 = arith.constant 0 : index
    %169 = vector.load %arg3[%c1, %c0_76, %c0_77] : memref<2x32x96xf32, #tpu.memory_space<vmem>>, vector<1x32x96xf32>
    %170 = vector.shape_cast %169 : vector<1x32x96xf32> to vector<32x96xf32>
    %c1_78 = arith.constant 1 : index
    %c0_79 = arith.constant 0 : index
    %c0_80 = arith.constant 0 : index
    %171 = vector.load %arg4[%c1_78, %c0_79, %c0_80] : memref<2x1x96xf32, #tpu.memory_space<vmem>>, vector<1x1x96xf32>
    %172 = vector.shape_cast %171 : vector<1x1x96xf32> to vector<1x96xf32>
    %c1_81 = arith.constant 1 : index
    %c0_82 = arith.constant 0 : index
    %c0_83 = arith.constant 0 : index
    %173 = vector.load %arg5[%c1_81, %c0_82, %c0_83] : memref<2x32x32xf32, #tpu.memory_space<vmem>>, vector<1x32x32xf32>
    %174 = vector.shape_cast %173 : vector<1x32x32xf32> to vector<32x32xf32>
    %c1_84 = arith.constant 1 : index
    %c0_85 = arith.constant 0 : index
    %c0_86 = arith.constant 0 : index
    %175 = vector.load %arg6[%c1_84, %c0_85, %c0_86] : memref<2x1x32xf32, #tpu.memory_space<vmem>>, vector<1x1x32xf32>
    %176 = vector.shape_cast %175 : vector<1x1x32xf32> to vector<1x32xf32>
    %c1_87 = arith.constant 1 : index
    %c0_88 = arith.constant 0 : index
    %c0_89 = arith.constant 0 : index
    %177 = vector.load %arg7[%c1_87, %c0_88, %c0_89] : memref<2x1x32xf32, #tpu.memory_space<vmem>>, vector<1x1x32xf32>
    %178 = vector.shape_cast %177 : vector<1x1x32xf32> to vector<1x32xf32>
    %c1_90 = arith.constant 1 : index
    %c0_91 = arith.constant 0 : index
    %c0_92 = arith.constant 0 : index
    %179 = vector.load %arg8[%c1_90, %c0_91, %c0_92] : memref<2x1x32xf32, #tpu.memory_space<vmem>>, vector<1x1x32xf32>
    %180 = vector.shape_cast %179 : vector<1x1x32xf32> to vector<1x32xf32>
    %c1_93 = arith.constant 1 : index
    %c0_94 = arith.constant 0 : index
    %c0_95 = arith.constant 0 : index
    %181 = vector.load %arg9[%c1_93, %c0_94, %c0_95] : memref<2x32x64xf32, #tpu.memory_space<vmem>>, vector<1x32x64xf32>
    %182 = vector.shape_cast %181 : vector<1x32x64xf32> to vector<32x64xf32>
    %c1_96 = arith.constant 1 : index
    %c0_97 = arith.constant 0 : index
    %c0_98 = arith.constant 0 : index
    %183 = vector.load %arg10[%c1_96, %c0_97, %c0_98] : memref<2x1x64xf32, #tpu.memory_space<vmem>>, vector<1x1x64xf32>
    %184 = vector.shape_cast %183 : vector<1x1x64xf32> to vector<1x64xf32>
    %c1_99 = arith.constant 1 : index
    %c0_100 = arith.constant 0 : index
    %c0_101 = arith.constant 0 : index
    %185 = vector.load %arg11[%c1_99, %c0_100, %c0_101] : memref<2x64x32xf32, #tpu.memory_space<vmem>>, vector<1x64x32xf32>
    %186 = vector.shape_cast %185 : vector<1x64x32xf32> to vector<64x32xf32>
    %c1_102 = arith.constant 1 : index
    %c0_103 = arith.constant 0 : index
    %c0_104 = arith.constant 0 : index
    %187 = vector.load %arg12[%c1_102, %c0_103, %c0_104] : memref<2x1x32xf32, #tpu.memory_space<vmem>>, vector<1x1x32xf32>
    %188 = vector.shape_cast %187 : vector<1x1x32xf32> to vector<1x32xf32>
    %c1_105 = arith.constant 1 : index
    %c0_106 = arith.constant 0 : index
    %c0_107 = arith.constant 0 : index
    %189 = vector.load %arg13[%c1_105, %c0_106, %c0_107] : memref<2x1x32xf32, #tpu.memory_space<vmem>>, vector<1x1x32xf32>
    %190 = vector.shape_cast %189 : vector<1x1x32xf32> to vector<1x32xf32>
    %c1_108 = arith.constant 1 : index
    %c0_109 = arith.constant 0 : index
    %c0_110 = arith.constant 0 : index
    %191 = vector.load %arg14[%c1_108, %c0_109, %c0_110] : memref<2x1x32xf32, #tpu.memory_space<vmem>>, vector<1x1x32xf32>
    %192 = vector.shape_cast %191 : vector<1x1x32xf32> to vector<1x32xf32>
    %cst_111 = arith.constant dense<0.000000e+00> : vector<16x96xf32>
    %193 = tpu.matmul %168, %170, %cst_111 {dimension_numbers = #tpu.dot_dimension_numbers<[1], [0], [0], [1], [0, 0, 1, 1], [], []>} : vector<16x32xf32>, vector<32x96xf32>, vector<16x96xf32> -> vector<16x96xf32>
    %194 = vector.broadcast %172 : vector<1x96xf32> to vector<16x96xf32>
    %195 = arith.addf %193, %194 : vector<16x96xf32>
    %196 = vector.extract_strided_slice %195 {offsets = [0, 0], sizes = [16, 32], strides = [1, 1]} : vector<16x96xf32> to vector<16x32xf32>
    %197 = vector.shape_cast %196 : vector<16x32xf32> to vector<2x8x32xf32>
    %198 = vector.extract_strided_slice %195 {offsets = [0, 32], sizes = [16, 32], strides = [1, 1]} : vector<16x96xf32> to vector<16x32xf32>
    %199 = vector.shape_cast %198 : vector<16x32xf32> to vector<2x8x32xf32>
    %200 = vector.extract_strided_slice %195 {offsets = [0, 64], sizes = [16, 32], strides = [1, 1]} : vector<16x96xf32> to vector<16x32xf32>
    %201 = vector.shape_cast %200 : vector<16x32xf32> to vector<2x8x32xf32>
    %cst_112 = arith.constant 0.000000e+00 : f32
    %202 = vector.broadcast %cst_112 : f32 to vector<16x32xf32>
    %203 = vector.extract_strided_slice %197 {offsets = [0, 0, 0], sizes = [2, 8, 16], strides = [1, 1, 1]} : vector<2x8x32xf32> to vector<2x8x16xf32>
    %204 = vector.extract_strided_slice %199 {offsets = [0, 0, 0], sizes = [2, 8, 16], strides = [1, 1, 1]} : vector<2x8x32xf32> to vector<2x8x16xf32>
    %205 = vector.extract_strided_slice %201 {offsets = [0, 0, 0], sizes = [2, 8, 16], strides = [1, 1, 1]} : vector<2x8x32xf32> to vector<2x8x16xf32>
    "tpu.trace_start"() <{level = 10 : i32, message = "bqd,bkd->bqk"}> : () -> ()
    %cst_113 = arith.constant dense<0.000000e+00> : vector<2x8x8xf32>
    %206 = tpu.matmul %203, %204, %cst_113 {dimension_numbers = #tpu.dot_dimension_numbers<[2], [2], [1], [1], [0, 0, 0, 1, 1, 1], [0], [0]>} : vector<2x8x16xf32>, vector<2x8x16xf32>, vector<2x8x8xf32> -> vector<2x8x8xf32>
    "tpu.trace_stop"() : () -> ()
    %cst_114 = arith.constant 2.500000e-01 : f32
    %207 = vector.broadcast %cst_114 : f32 to vector<2x8x8xf32>
    %208 = arith.mulf %206, %207 : vector<2x8x8xf32>
    %cst_115 = arith.constant dense<0xFF800000> : vector<2x8xf32>
    %209 = vector.multi_reduction <maximumf>, %208, %cst_115 [2] : vector<2x8x8xf32> to vector<2x8xf32>
    %210 = vector.shape_cast %209 : vector<2x8xf32> to vector<2x8x1xf32>
    %211 = vector.broadcast %210 : vector<2x8x1xf32> to vector<2x8x8xf32>
    %212 = arith.subf %208, %211 : vector<2x8x8xf32>
    %213 = math.exp %212 : vector<2x8x8xf32>
    %cst_116 = arith.constant dense<0.000000e+00> : vector<2x8xf32>
    %214 = vector.multi_reduction <add>, %213, %cst_116 [2] : vector<2x8x8xf32> to vector<2x8xf32>
    %215 = vector.shape_cast %214 : vector<2x8xf32> to vector<2x8x1xf32>
    %216 = tpu.reciprocal %215 {approx = true} : vector<2x8x1xf32> -> vector<2x8x1xf32>
    %217 = vector.broadcast %216 : vector<2x8x1xf32> to vector<2x8x8xf32>
    %218 = arith.mulf %213, %217 : vector<2x8x8xf32>
    "tpu.trace_start"() <{level = 10 : i32, message = "bqk,bkd->bqd"}> : () -> ()
    %cst_117 = arith.constant dense<0.000000e+00> : vector<2x8x16xf32>
    %219 = tpu.matmul %218, %205, %cst_117 {dimension_numbers = #tpu.dot_dimension_numbers<[2], [1], [1], [2], [0, 0, 0, 1, 1, 2], [0], [0]>} : vector<2x8x8xf32>, vector<2x8x16xf32>, vector<2x8x16xf32> -> vector<2x8x16xf32>
    "tpu.trace_stop"() : () -> ()
    %220 = vector.shape_cast %219 : vector<2x8x16xf32> to vector<16x16xf32>
    %221 = vector.extract_strided_slice %174 {offsets = [0, 0], sizes = [16, 32], strides = [1, 1]} : vector<32x32xf32> to vector<16x32xf32>
    %cst_118 = arith.constant dense<0.000000e+00> : vector<16x32xf32>
    %222 = tpu.matmul %220, %221, %cst_118 {dimension_numbers = #tpu.dot_dimension_numbers<[1], [0], [0], [1], [0, 0, 1, 1], [], []>} : vector<16x16xf32>, vector<16x32xf32>, vector<16x32xf32> -> vector<16x32xf32>
    %223 = arith.addf %202, %222 : vector<16x32xf32>
    %224 = vector.extract_strided_slice %197 {offsets = [0, 0, 16], sizes = [2, 8, 16], strides = [1, 1, 1]} : vector<2x8x32xf32> to vector<2x8x16xf32>
    %225 = vector.extract_strided_slice %199 {offsets = [0, 0, 16], sizes = [2, 8, 16], strides = [1, 1, 1]} : vector<2x8x32xf32> to vector<2x8x16xf32>
    %226 = vector.extract_strided_slice %201 {offsets = [0, 0, 16], sizes = [2, 8, 16], strides = [1, 1, 1]} : vector<2x8x32xf32> to vector<2x8x16xf32>
    "tpu.trace_start"() <{level = 10 : i32, message = "bqd,bkd->bqk"}> : () -> ()
    %cst_119 = arith.constant dense<0.000000e+00> : vector<2x8x8xf32>
    %227 = tpu.matmul %224, %225, %cst_119 {dimension_numbers = #tpu.dot_dimension_numbers<[2], [2], [1], [1], [0, 0, 0, 1, 1, 1], [0], [0]>} : vector<2x8x16xf32>, vector<2x8x16xf32>, vector<2x8x8xf32> -> vector<2x8x8xf32>
    "tpu.trace_stop"() : () -> ()
    %cst_120 = arith.constant 2.500000e-01 : f32
    %228 = vector.broadcast %cst_120 : f32 to vector<2x8x8xf32>
    %229 = arith.mulf %227, %228 : vector<2x8x8xf32>
    %cst_121 = arith.constant dense<0xFF800000> : vector<2x8xf32>
    %230 = vector.multi_reduction <maximumf>, %229, %cst_121 [2] : vector<2x8x8xf32> to vector<2x8xf32>
    %231 = vector.shape_cast %230 : vector<2x8xf32> to vector<2x8x1xf32>
    %232 = vector.broadcast %231 : vector<2x8x1xf32> to vector<2x8x8xf32>
    %233 = arith.subf %229, %232 : vector<2x8x8xf32>
    %234 = math.exp %233 : vector<2x8x8xf32>
    %cst_122 = arith.constant dense<0.000000e+00> : vector<2x8xf32>
    %235 = vector.multi_reduction <add>, %234, %cst_122 [2] : vector<2x8x8xf32> to vector<2x8xf32>
    %236 = vector.shape_cast %235 : vector<2x8xf32> to vector<2x8x1xf32>
    %237 = tpu.reciprocal %236 {approx = true} : vector<2x8x1xf32> -> vector<2x8x1xf32>
    %238 = vector.broadcast %237 : vector<2x8x1xf32> to vector<2x8x8xf32>
    %239 = arith.mulf %234, %238 : vector<2x8x8xf32>
    "tpu.trace_start"() <{level = 10 : i32, message = "bqk,bkd->bqd"}> : () -> ()
    %cst_123 = arith.constant dense<0.000000e+00> : vector<2x8x16xf32>
    %240 = tpu.matmul %239, %226, %cst_123 {dimension_numbers = #tpu.dot_dimension_numbers<[2], [1], [1], [2], [0, 0, 0, 1, 1, 2], [0], [0]>} : vector<2x8x8xf32>, vector<2x8x16xf32>, vector<2x8x16xf32> -> vector<2x8x16xf32>
    "tpu.trace_stop"() : () -> ()
    %241 = vector.shape_cast %240 : vector<2x8x16xf32> to vector<16x16xf32>
    %242 = vector.extract_strided_slice %174 {offsets = [16, 0], sizes = [16, 32], strides = [1, 1]} : vector<32x32xf32> to vector<16x32xf32>
    %cst_124 = arith.constant dense<0.000000e+00> : vector<16x32xf32>
    %243 = tpu.matmul %241, %242, %cst_124 {dimension_numbers = #tpu.dot_dimension_numbers<[1], [0], [0], [1], [0, 0, 1, 1], [], []>} : vector<16x16xf32>, vector<16x32xf32>, vector<16x32xf32> -> vector<16x32xf32>
    %244 = arith.addf %223, %243 : vector<16x32xf32>
    %245 = vector.broadcast %176 : vector<1x32xf32> to vector<16x32xf32>
    %246 = arith.addf %244, %245 : vector<16x32xf32>
    %247 = arith.addf %168, %246 : vector<16x32xf32>
    %cst_125 = arith.constant dense<0.000000e+00> : vector<16xf32>
    %248 = vector.multi_reduction <add>, %247, %cst_125 [1] : vector<16x32xf32> to vector<16xf32>
    %249 = vector.shape_cast %248 : vector<16xf32> to vector<16x1xf32>
    %cst_126 = arith.constant 3.200000e+01 : f32
    %250 = vector.broadcast %cst_126 : f32 to vector<16x1xf32>
    %251 = arith.divf %249, %250 : vector<16x1xf32>
    %252 = vector.broadcast %251 : vector<16x1xf32> to vector<16x32xf32>
    %253 = arith.subf %247, %252 : vector<16x32xf32>
    %254 = arith.mulf %253, %253 : vector<16x32xf32>
    %cst_127 = arith.constant dense<0.000000e+00> : vector<16xf32>
    %255 = vector.multi_reduction <add>, %254, %cst_127 [1] : vector<16x32xf32> to vector<16xf32>
    %256 = vector.shape_cast %255 : vector<16xf32> to vector<16x1xf32>
    %cst_128 = arith.constant 3.200000e+01 : f32
    %257 = vector.broadcast %cst_128 : f32 to vector<16x1xf32>
    %258 = arith.divf %256, %257 : vector<16x1xf32>
    %259 = vector.broadcast %251 : vector<16x1xf32> to vector<16x32xf32>
    %260 = arith.subf %247, %259 : vector<16x32xf32>
    %cst_129 = arith.constant 9.99999996E-13 : f32
    %261 = vector.broadcast %cst_129 : f32 to vector<16x1xf32>
    %262 = arith.addf %258, %261 : vector<16x1xf32>
    %263 = math.rsqrt %262 : vector<16x1xf32>
    %264 = vector.broadcast %263 : vector<16x1xf32> to vector<16x32xf32>
    %265 = arith.mulf %260, %264 : vector<16x32xf32>
    %266 = vector.broadcast %178 : vector<1x32xf32> to vector<16x32xf32>
    %267 = arith.mulf %265, %266 : vector<16x32xf32>
    %268 = vector.broadcast %180 : vector<1x32xf32> to vector<16x32xf32>
    %269 = arith.addf %267, %268 : vector<16x32xf32>
    %cst_130 = arith.constant dense<0.000000e+00> : vector<16x64xf32>
    %270 = tpu.matmul %269, %182, %cst_130 {dimension_numbers = #tpu.dot_dimension_numbers<[1], [0], [0], [1], [0, 0, 1, 1], [], []>} : vector<16x32xf32>, vector<32x64xf32>, vector<16x64xf32> -> vector<16x64xf32>
    %271 = vector.broadcast %184 : vector<1x64xf32> to vector<16x64xf32>
    %272 = arith.addf %270, %271 : vector<16x64xf32>
    %273 = arith.mulf %272, %272 : vector<16x64xf32>
    %274 = arith.mulf %272, %273 : vector<16x64xf32>
    %cst_131 = arith.constant 4.471500e-02 : f32
    %275 = vector.broadcast %cst_131 : f32 to vector<16x64xf32>
    %276 = arith.mulf %275, %274 : vector<16x64xf32>
    %277 = arith.addf %272, %276 : vector<16x64xf32>
    %cst_132 = arith.constant 0.797884583 : f32
    %278 = vector.broadcast %cst_132 : f32 to vector<16x64xf32>
    %279 = arith.mulf %278, %277 : vector<16x64xf32>
    %280 = math.tanh %279 : vector<16x64xf32>
    %cst_133 = arith.constant 1.000000e+00 : f32
    %281 = vector.broadcast %cst_133 : f32 to vector<16x64xf32>
    %282 = arith.addf %281, %280 : vector<16x64xf32>
    %cst_134 = arith.constant 5.000000e-01 : f32
    %283 = vector.broadcast %cst_134 : f32 to vector<16x64xf32>
    %284 = arith.mulf %283, %282 : vector<16x64xf32>
    %285 = arith.mulf %272, %284 : vector<16x64xf32>
    %cst_135 = arith.constant dense<0.000000e+00> : vector<16x32xf32>
    %286 = tpu.matmul %285, %186, %cst_135 {dimension_numbers = #tpu.dot_dimension_numbers<[1], [0], [0], [1], [0, 0, 1, 1], [], []>} : vector<16x64xf32>, vector<64x32xf32>, vector<16x32xf32> -> vector<16x32xf32>
    %287 = vector.broadcast %188 : vector<1x32xf32> to vector<16x32xf32>
    %288 = arith.addf %286, %287 : vector<16x32xf32>
    %289 = arith.addf %269, %288 : vector<16x32xf32>
    %cst_136 = arith.constant dense<0.000000e+00> : vector<16xf32>
    %290 = vector.multi_reduction <add>, %289, %cst_136 [1] : vector<16x32xf32> to vector<16xf32>
    %291 = vector.shape_cast %290 : vector<16xf32> to vector<16x1xf32>
    %cst_137 = arith.constant 3.200000e+01 : f32
    %292 = vector.broadcast %cst_137 : f32 to vector<16x1xf32>
    %293 = arith.divf %291, %292 : vector<16x1xf32>
    %294 = vector.broadcast %293 : vector<16x1xf32> to vector<16x32xf32>
    %295 = arith.subf %289, %294 : vector<16x32xf32>
    %296 = arith.mulf %295, %295 : vector<16x32xf32>
    %cst_138 = arith.constant dense<0.000000e+00> : vector<16xf32>
    %297 = vector.multi_reduction <add>, %296, %cst_138 [1] : vector<16x32xf32> to vector<16xf32>
    %298 = vector.shape_cast %297 : vector<16xf32> to vector<16x1xf32>
    %cst_139 = arith.constant 3.200000e+01 : f32
    %299 = vector.broadcast %cst_139 : f32 to vector<16x1xf32>
    %300 = arith.divf %298, %299 : vector<16x1xf32>
    %301 = vector.broadcast %293 : vector<16x1xf32> to vector<16x32xf32>
    %302 = arith.subf %289, %301 : vector<16x32xf32>
    %cst_140 = arith.constant 9.99999996E-13 : f32
    %303 = vector.broadcast %cst_140 : f32 to vector<16x1xf32>
    %304 = arith.addf %300, %303 : vector<16x1xf32>
    %305 = math.rsqrt %304 : vector<16x1xf32>
    %306 = vector.broadcast %305 : vector<16x1xf32> to vector<16x32xf32>
    %307 = arith.mulf %302, %306 : vector<16x32xf32>
    %308 = vector.broadcast %190 : vector<1x32xf32> to vector<16x32xf32>
    %309 = arith.mulf %307, %308 : vector<16x32xf32>
    %310 = vector.broadcast %192 : vector<1x32xf32> to vector<16x32xf32>
    %311 = arith.addf %309, %310 : vector<16x32xf32>
    %312 = vector.extract_strided_slice %311 {offsets = [0, 0], sizes = [1, 32], strides = [1, 1]} : vector<16x32xf32> to vector<1x32xf32>
    %313 = vector.extract_strided_slice %311 {offsets = [8, 0], sizes = [1, 32], strides = [1, 1]} : vector<16x32xf32> to vector<1x32xf32>
    %314 = tpu.concatenate %312, %313 in 0 : vector<1x32xf32>, vector<1x32xf32> -> vector<2x32xf32>
    %c0_141 = arith.constant 0 : index
    %c0_142 = arith.constant 0 : index
    %315 = vector.load %arg15[%c0_141, %c0_142] : memref<32x32xf32, #tpu.memory_space<vmem>>, vector<32x32xf32>
    %cst_143 = arith.constant dense<0.000000e+00> : vector<2x32xf32>
    %316 = tpu.matmul %314, %315, %cst_143 {dimension_numbers = #tpu.dot_dimension_numbers<[1], [0], [0], [1], [0, 0, 1, 1], [], []>} : vector<2x32xf32>, vector<32x32xf32>, vector<2x32xf32> -> vector<2x32xf32>
    %c0_144 = arith.constant 0 : index
    %c0_145 = arith.constant 0 : index
    %317 = vector.load %arg16[%c0_144, %c0_145] : memref<1x32xf32, #tpu.memory_space<vmem>>, vector<1x32xf32>
    %318 = vector.broadcast %317 : vector<1x32xf32> to vector<2x32xf32>
    %319 = arith.addf %316, %318 : vector<2x32xf32>
    %320 = math.tanh %319 : vector<2x32xf32>
    %c0_146 = arith.constant 0 : index
    %c0_147 = arith.constant 0 : index
    %321 = vector.load %arg17[%c0_146, %c0_147] : memref<32x128xf32, #tpu.memory_space<vmem>>, vector<32x128xf32>
    %cst_148 = arith.constant dense<0.000000e+00> : vector<2x128xf32>
    %322 = tpu.matmul %320, %321, %cst_148 {dimension_numbers = #tpu.dot_dimension_numbers<[1], [0], [0], [1], [0, 0, 1, 1], [], []>} : vector<2x32xf32>, vector<32x128xf32>, vector<2x128xf32> -> vector<2x128xf32>
    %c0_149 = arith.constant 0 : index
    %c0_150 = arith.constant 0 : index
    %323 = vector.load %arg18[%c0_149, %c0_150] : memref<1x128xf32, #tpu.memory_space<vmem>>, vector<1x128xf32>
    %324 = vector.broadcast %323 : vector<1x128xf32> to vector<2x128xf32>
    %325 = arith.addf %322, %324 : vector<2x128xf32>
    %c0_151 = arith.constant 0 : index
    %c0_152 = arith.constant 0 : index
    %326 = vector.load %arg19[%c0_151, %c0_152] : memref<2x128xf32, #tpu.memory_space<vmem>>, vector<2x128xf32>
    tpu.vector_store %arg19[%c0_151, %c0_152], %325 {strides = array<i32>} : memref<2x128xf32, #tpu.memory_space<vmem>>, vector<2x128xf32>,
    return
  }
}

</mosaic_0001>

<bundles_post_ra>
// kernel: pretrain_bert_forward.1
= control target key start
LH: loop header
LB: loop body
LE: loop exit
PB: predicated region body
PF: predicated region fallthrough
CT: control target
= control target key end

     0   :  { %s3808_s0 = inlined_call_operand.vmem [shape: f32[2,8,32], index: 0, kind: input, shape index: {}]   ;;  %s3809_s1 = inlined_call_operand.vmem [shape: f32[1,32], index: 1, kind: input, shape index: {}]   ;;  %s3810_s2 = inlined_call_operand.vmem [shape: f32[1,32], index: 2, kind: input, shape index: {}]   ;;  %s3811_s3 = inlined_call_operand.vmem [shape: f32[2,32,96], index: 3, kind: input, shape index: {}]   ;;  %s3812_s4 = inlined_call_operand.vmem [shape: f32[2,1,96], index: 4, kind: input, shape index: {}]   ;;  %s3813_s5 = inlined_call_operand.vmem [shape: f32[2,32,32], index: 5, kind: input, shape index: {}]   ;;  %s3814_s6 = inlined_call_operand.vmem [shape: f32[2,1,32], index: 6, kind: input, shape index: {}]   ;;  %s3815_s7 = inlined_call_operand.vmem [shape: f32[2,1,32], index: 7, kind: input, shape index: {}]   ;;  %s3816_s8 = inlined_call_operand.vmem [shape: f32[2,1,32], index: 8, kind: input, shape index: {}]   ;;  %s3817_s9 = inlined_call_operand.vmem [shape: f32[2,32,64], index: 9, kind: input, shape index: {}]   ;;  %s3818_s10 = inlined_call_operand.vmem [shape: f32[2,1,64], index: 10, kind: input, shape index: {}]   ;;  %s3819_s11 = inlined_call_operand.vmem [shape: f32[2,64,32], index: 11, kind: input, shape index: {}]   ;;  %s3820_s12 = inlined_call_operand.vmem [shape: f32[2,1,32], index: 12, kind: input, shape index: {}]   ;;  %s3821_s13 = inlined_call_operand.vmem [shape: f32[2,1,32], index: 13, kind: input, shape index: {}]   ;;  %s3822_s14 = inlined_call_operand.vmem [shape: f32[2,1,32], index: 14, kind: input, shape index: {}]   ;;  %s3823_s15 = inlined_call_operand.vmem [shape: f32[32,32], index: 15, kind: input, shape index: {}]   ;;  %s3824_s16 = inlined_call_operand.vmem [shape: f32[1,32], index: 16, kind: input, shape index: {}]   ;;  %s3825_s17 = inlined_call_operand.vmem [shape: f32[32,128], index: 17, kind: input, shape index: {}]   ;;  %s3826_s18 = inlined_call_operand.vmem [shape: f32[1,128], index: 18, kind: input, shape index: {}]   ;;  %s3827_s19 = inlined_call_operand.hbm [shape: f32[2,128], index: 19, kind: output, shape index: {}]  }
   0x1   :  { %3830 = sst [smem:[#allocation5_spill]] %s3808_s0 }
   0x2   :  { %3831 = sst [smem:[#allocation6_spill]] %s3809_s1 }
   0x3   :  { %3832 = sst [smem:[#allocation7_spill]] %s3810_s2 }
   0x4   :  { %3833 = sst [smem:[#allocation8_spill]] %s3811_s3 }
   0x5   :  { %s3834_s20 = sld [smem:[#allocation5_spill]]  ;;  %vm67_vm0 = vcmask 261120  }
   0xb   :  { %v63_v0 = vld [vmem:[%s3834_s20] sm:$0xff]  ;;  %v64_v1 = vld [vmem:[%s3834_s20 + $0x8] sm:$0xff] }
   0xc   :  { %24 = vsyncpa [#allocation3], 0  ;;  %v68_v2 = vsel %vm67_vm0, %v63_v0, 0.0  ;;  %v71_v3 = vsel %vm67_vm0, %v64_v1, 0.0  ;;  %s3835_s23 = sld [smem:[#allocation8_spill]]  ;;  %v3269_v34 = vmov 0.0  }
   0xd   :  { %69 = vadd.xlane.f32.xlu0 %v68_v2  ;;  %s3836_s30 = sld [smem:[#allocation6_spill]]  ;;  %2976 = vmatprep.subr.mxu1 %v3269_v34  ;;  %vm3270_vm1 = vmmov 0   ;;  %v2771_v35 = vld [vmem:[%s3812_s4] ss:$0 sm:$0xff]  ;;  %s3271_s24 = smov 96   ;;  %vm229_vm2 = vcmask 130048  }
   0xe   :  { %s3837_s1 = sld [smem:[#allocation7_spill]]  ;;  %2978 = vmatprep.mubr.msk.f32.mxu1 %vm3270_vm1, %v3269_v34  ;;  %vm383_vm3 = vcmask 64512   ;;  %s3272_s25 = smov 64   ;;  %vm1215_vm4 = vcmask 523264   ;;  %vm2583_vm5 = vcmask 1040384  }
   0xf   :  { %s3273_s3 = smov 80   ;;  %s3274_s26 = smov 112  }
  0x10   :  { %s3275_s27 = smov 48  }
  0x11   :  { %72 = vadd.xlane.f32.xlu0 %v71_v3 }
  0x12   :  { %v114_v14 = vld [vmem:[%s3835_s23 + $0x18] sm:$0xff]  ;;  %v113_v15 = vld [vmem:[%s3835_s23 + $0x10] sm:$0xff]  ;;  %v112_v16 = vld [vmem:[%s3835_s23 + $0x8] sm:$0xff] }
  0x13   :  { %2965 = vmatprep.subr.mxu0 %v114_v14  ;;  %v111_v17 = vld [vmem:[%s3835_s23] sm:$0xff] }
  0x14   :  { %2966 = vmatpush3.msra.mxu0 %v114_v14  ;;  %v2769_v25 = vld [vmem:[%s3836_s30] ss:$0 sm:$0xff] }
  0x15   :  { %2967 = vmatprep.subr.mxu0 %v113_v15  ;;  %v2770_v27 = vld [vmem:[%s3837_s1] ss:$0 sm:$0xff] }
  0x16   :  { %2968 = vmatpush3.msra.mxu0 %v113_v15 }
  0x17   :  { %2969 = vmatprep.subr.mxu0 %v112_v16 }
  0x18   :  { %2970 = vmatpush3.msra.mxu0 %v112_v16 }
  0x19   :  { %2971 = vmatprep.subr.mxu0 %v111_v17 }
  0x1a   :  { %2972 = vmatpush3.msra.mxu0 %v111_v17 }
  0x1b   :  { %2996 = vmatprep.subr.mxu0 %v3269_v34 }
  0x96   :  { %v70_v4 = vpop.xlane.xlu0 %69 }
  0x97   :  { %v75_v5 = vmul.f32 0.03125, %v70_v4 }
  0x99   :  { %v77_v6 = vsub.f32 %v63_v0, %v75_v5 }
  0x9a   :  { %v73_v7 = vpop.xlane.xlu0 %72 }
  0x9b   :  { %v76_v8 = vmul.f32 0.03125, %v73_v7  ;;  %v79_v9 = vmul.f32 %v77_v6, %v77_v6 }
  0x9d   :  { %v78_v10 = vsub.f32 %v64_v1, %v76_v8  ;;  %v81_v11 = vsel %vm67_vm0, %v79_v9, 0.0 }
  0x9e   :  { %82 = vadd.xlane.f32.xlu1 %v81_v11 }
  0x9f   :  { %v80_v12 = vmul.f32 %v78_v10, %v78_v10 }
  0xa1   :  { %v84_v13 = vsel %vm67_vm0, %v80_v12, 0.0 }
  0xa2   :  { %85 = vadd.xlane.f32.xlu1 %v84_v13 }
 0x127   :  { %v83_v18 = vpop.xlane.xlu1 %82 }
 0x128   :  { %v87_v19 = vmul.f32 0.03125, %v83_v18 }
 0x12a   :  { %v89_v20 = vadd.f32 1e-12, %v87_v19 }
 0x12b   :  { %v86_v21 = vpop.xlane.xlu1 %85 }
 0x12c   :  { %3185 = vrsqrt.f32 %v89_v20  ;;  %v88_v22 = vmul.f32 0.03125, %v86_v21 }
 0x12e   :  { %v90_v23 = vadd.f32 1e-12, %v88_v22 }
 0x130   :  { %3187 = vrsqrt.f32 %v90_v23 }
 0x139   :  { %v3186_v24 = vpop.eup %3185 }
 0x13a   :  { %v93_v26 = vmul.f32 %v3186_v24, %v77_v6 }
 0x13c   :  { %v101_v28 = vmul.f32 %v2769_v25, %v93_v26 }
 0x13d   :  { %v3188_v29 = vpop.eup %3187 }
 0x13e   :  { %v94_v30 = vmul.f32 %v3188_v29, %v78_v10  ;;  %v3405_v31 = vadd.f32 %v2770_v27, %v101_v28 }
 0x140   :  { %v102_v32 = vmul.f32 %v2769_v25, %v94_v30  ;;  %2973 = vmatprep.mubr.msk.f32.mxu0 %vm67_vm0, %v3405_v31 }
 0x142   :  { %v3409_v33 = vadd.f32 %v2770_v27, %v102_v32  ;;  %v117_v32 = vld [vmem:[%s3813_s5 + $0x8] sm:$0xff] }
 0x144   :  { %2974 = vmatmul.mubr.msk.f32.vlgmr.msra.gmra.mxu0 %vm67_vm0, %v3409_v33 }
 0x145   :  { %2998 = vmatprep.mubr.msk.f32.mxu0 %vm3270_vm1, %v3269_v34 }
 0x204   :  { %v2975_v36 = vpop.f32.mrf.mxu0 }
 0x205   :  { %v3422_v37 = vadd.f32 %v2975_v36, %v2771_v35 }
 0x206   :  { %v217_v38 = vpop.f32.mrf.mxu0 }
 0x207   :  { %v3424_v39 = vadd.f32 %v2771_v35, %v217_v38  ;;  %305 = vrot.lane.b32.xlu1 %v3422_v37, %s3271_s24 }
 0x209   :  { %227 = vrot.lane.b32.xlu0 %v3424_v39, %s3271_s24 }
 0x279   :  { %v306_v41 = vpop.permute.xlu1 %305 }
 0x27b   :  { %v228_v40 = vpop.permute.xlu0 %227 }
 0x27c   :  { %2977 = vmatpush3.xpose.msk.msra.mxu1 %vm229_vm2, %v228_v40 }
 0x27d   :  { %2981 = vmatprep.subr.mxu1 %v3269_v34 }
 0x27f   :  { %2979 = vmatmul.mubr.msk.f32.vlgmr.msra.gmra.mxu1 %vm229_vm2, %v3424_v39 }
 0x280   :  { %2982 = vmatpush3.xpose.msk.msra.mxu1 %vm229_vm2, %v306_v41  ;;  %2983 = vmatprep.mubr.msk.f32.mxu1 %vm3270_vm1, %v3269_v34 }
 0x281   :  { %2986 = vmatprep.subr.mxu1 %v3269_v34 }
 0x283   :  { %2984 = vmatmul.mubr.msk.f32.vlgmr.msra.gmra.mxu1 %vm229_vm2, %v3422_v37 }
 0x284   :  { %2988 = vmatprep.mubr.msk.f32.mxu1 %vm3270_vm1, %v3269_v34 }
 0x33f   :  { %v300_v42 = vpop.f32.mrf.mxu1 }
 0x340   :  { %v381_v43 = vmul.f32 0.25, %v300_v42 }
 0x341   :  { %v2980_v44 = vpop.f32.mrf.mxu1 }
 0x342   :  { %v384_v45 = vsel %vm383_vm3, %v381_v43, -inf  ;;  %v118_v44 = vld [vmem:[%s3813_s5 + $0x10] sm:$0xff] }
 0x343   :  { %385 = vmax.xlane.f32.xlu1 %v384_v45  ;;  %v377_v46 = vpop.f32.mrf.mxu1 }
 0x344   :  { %v382_v47 = vmul.f32 0.25, %v377_v46 }
 0x345   :  { %v2985_v48 = vpop.f32.mrf.mxu1 }
 0x346   :  { %v387_v49 = vsel %vm383_vm3, %v382_v47, -inf }
 0x347   :  { %388 = vmax.xlane.f32.xlu0 %v387_v49 }
 0x354   :  { %482 = vrot.lane.b32.xlu1 %v3422_v37, %s3272_s25 }
 0x358   :  { %560 = vrot.lane.b32.xlu1 %v3424_v39, %s3273_s3 }
 0x35c   :  { %638 = vrot.lane.b32.xlu1 %v3422_v37, %s3273_s3 }
 0x3cc   :  { %v386_v50 = vpop.xlane.xlu1 %385 }
 0x3cd   :  { %v390_v51 = vsub.f32 %v381_v43, %v386_v50  ;;  %v119_v43 = vld [vmem:[%s3813_s5 + $0x18] sm:$0xff]  ;;  %v2790_v50 = vld [vmem:[%s3814_s6] ss:$0 sm:$0xff] }
 0x3cf   :  { %v392_v52 = vmul.f32 1.442695, %v390_v51 }
 0x3d0   :  { %v483_v53 = vpop.permute.xlu1 %482  ;;  %v389_v54 = vpop.xlane.xlu0 %388 }
 0x3d1   :  { %3189 = vpow2.f32 %v392_v52  ;;  %v391_v55 = vsub.f32 %v382_v47, %v389_v54 }
 0x3d3   :  { %v394_v56 = vmul.f32 1.442695, %v391_v55 }
 0x3d4   :  { %v561_v57 = vpop.permute.xlu1 %560 }
 0x3d5   :  { %3191 = vpow2.f32 %v394_v56  ;;  %2997 = vmatpush3.xpose.msk.msra.mxu0 %vm229_vm2, %v561_v57 }
 0x3d6   :  { %3006 = vmatprep.subr.mxu0 %v3269_v34 }
 0x3d8   :  { %v639_v62 = vpop.permute.xlu1 %638 }
 0x3de   :  { %v3190_v58 = vpop.eup %3189 }
 0x3df   :  { %v396_v59 = vsel %vm383_vm3, %v3190_v58, 0.0 }
 0x3e0   :  { %397 = vadd.xlane.f32.xlu0 %v396_v59 }
 0x3e2   :  { %v3192_v60 = vpop.eup %3191 }
 0x3e3   :  { %v399_v61 = vsel %vm383_vm3, %v3192_v60, 0.0 }
 0x3e4   :  { %400 = vadd.xlane.f32.xlu1 %v399_v61 }
 0x3f5   :  { %636 = vrot.lane.b32.xlu1 %v3422_v37, %s3274_s26 }
 0x3f6   :  { %406 = vrot.lane.b32.xlu0 %v3424_v39, %s3272_s25 }
 0x3fa   :  { %558 = vrot.lane.b32.xlu0 %v3424_v39, %s3274_s26 }
 0x469   :  { %v398_v63 = vpop.xlane.xlu0 %397 }
 0x46a   :  { %3193 = vrcp.f32 %v398_v63 }
 0x46d   :  { %v401_v0 = vpop.xlane.xlu1 %400  ;;  %v407_v1 = vpop.permute.xlu0 %406 }
 0x46e   :  { %3195 = vrcp.f32 %v401_v0  ;;  %2987 = vmatpush3.msra.mxu1 %v407_v1 }
 0x46f   :  { %2991 = vmatprep.subr.mxu1 %v3269_v34 }
 0x471   :  { %v559_v2 = vpop.permute.xlu0 %558  ;;  %v637_v7 = vpop.permute.xlu1 %636 }
 0x472   :  { %2999 = vmatmul.mubr.msk.f32.vlgmr.msra.gmra.mxu0 %vm229_vm2, %v559_v2 }
 0x473   :  { %3008 = vmatprep.mubr.msk.f32.mxu0 %vm3270_vm1, %v3269_v34 }
 0x477   :  { %v3194_v3 = vpop.eup %3193 }
 0x478   :  { %v404_v4 = vmul.f32 %v3194_v3, %v3190_v58 }
 0x47a   :  { %2989 = vmatmul.mubr.msk.f32.vlgmr.msra.gmra.mxu1 %vm383_vm3, %v404_v4 }
 0x47b   :  { %v3196_v5 = vpop.eup %3195  ;;  %2992 = vmatpush3.msra.mxu1 %v483_v53  ;;  %2993 = vmatprep.mubr.msk.f32.mxu1 %vm3270_vm1, %v3269_v34 }
 0x47c   :  { %3001 = vmatprep.subr.mxu1 %v3269_v34  ;;  %v405_v6 = vmul.f32 %v3196_v5, %v3192_v60 }
 0x47e   :  { %2994 = vmatmul.mubr.msk.f32.vlgmr.msra.gmra.mxu1 %vm383_vm3, %v405_v6 }
 0x47f   :  { %3002 = vmatpush3.xpose.msk.msra.mxu1 %vm229_vm2, %v639_v62  ;;  %3003 = vmatprep.mubr.msk.f32.mxu1 %vm3270_vm1, %v3269_v34 }
 0x480   :  { %3011 = vmatprep.subr.mxu1 %v3269_v34 }
 0x482   :  { %3004 = vmatmul.mubr.msk.f32.vlgmr.msra.gmra.mxu1 %vm229_vm2, %v637_v7  ;;  %v125_v7 = vld [vmem:[%s3817_s9 + $0x10] sm:$0xff] }
 0x483   :  { %3013 = vmatprep.mubr.msk.f32.mxu1 %vm3270_vm1, %v3269_v34 }
 0x532   :  { %v632_v8 = vpop.f32.mrf.mxu0 }
 0x533   :  { %v714_v9 = vmul.f32 0.25, %v632_v8  ;;  %v124_v8 = vld [vmem:[%s3817_s9 + $0x8] sm:$0xff] }
 0x534   :  { %v3000_v10 = vpop.f32.mrf.mxu0 }
 0x535   :  { %v716_v11 = vsel %vm383_vm3, %v714_v9, -inf }
 0x536   :  { %717 = vmax.xlane.f32.xlu0 %v716_v11 }
 0x53a   :  { %v478_v12 = vpop.f32.mrf.mxu1 }
 0x53c   :  { %v2990_v13 = vpop.f32.mrf.mxu1 }
 0x53e   :  { %v554_v14 = vpop.f32.mrf.mxu1 }
 0x540   :  { %v2995_v15 = vpop.f32.mrf.mxu1 }
 0x542   :  { %v710_v16 = vpop.f32.mrf.mxu1 }
 0x543   :  { %v715_v17 = vmul.f32 0.25, %v710_v16 }
 0x544   :  { %v3005_v18 = vpop.f32.mrf.mxu1 }
 0x545   :  { %v719_v19 = vsel %vm383_vm3, %v715_v17, -inf }
 0x546   :  { %720 = vmax.xlane.f32.xlu1 %v719_v19 }
 0x557   :  { %814 = vrot.lane.b32.xlu1 %v3422_v37, %s3275_s27 }
 0x5bf   :  { %v718_v20 = vpop.xlane.xlu0 %717 }
 0x5c0   :  { %v722_v21 = vsub.f32 %v714_v9, %v718_v20  ;;  %v123_v9 = vld [vmem:[%s3817_s9] sm:$0xff] }
 0x5c2   :  { %v724_v22 = vmul.f32 1.442695, %v722_v21 }
 0x5c4   :  { %3197 = vpow2.f32 %v724_v22  ;;  %v2792_v22 = vld [vmem:[%s3816_s8] ss:$0 sm:$0xff] }
 0x5cf   :  { %v721_v23 = vpop.xlane.xlu1 %720 }
 0x5d0   :  { %v723_v24 = vsub.f32 %v715_v17, %v721_v23  ;;  %v2791_v17 = vld [vmem:[%s3815_s7] ss:$0 sm:$0xff] }
 0x5d1   :  { %v3198_v25 = vpop.eup %3197 }
 0x5d2   :  { %v726_v26 = vmul.f32 1.442695, %v723_v24  ;;  %v728_v27 = vsel %vm383_vm3, %v3198_v25, 0.0 }
 0x5d3   :  { %729 = vadd.xlane.f32.xlu0 %v728_v27  ;;  %v815_v28 = vpop.permute.xlu1 %814  ;;  %v134_v27 = vld [vmem:[%s3819_s11 + $0x30] sm:$0xff] }
 0x5d4   :  { %3199 = vpow2.f32 %v726_v26  ;;  %3012 = vmatpush3.msra.mxu1 %v815_v28  ;;  %v135_v26 = vld [vmem:[%s3819_s11 + $0x38] sm:$0xff]  ;;  %v133_v28 = vld [vmem:[%s3819_s11 + $0x28] sm:$0xff] }
 0x5d5   :  { %3023 = vmatprep.subr.mxu1 %v117_v32 }
 0x5e1   :  { %v3200_v29 = vpop.eup %3199 }
 0x5e2   :  { %v731_v30 = vsel %vm383_vm3, %v3200_v29, 0.0 }
 0x5e3   :  { %732 = vadd.xlane.f32.xlu0 %v731_v30  ;;  %v131_v30 = vld [vmem:[%s3819_s11 + $0x18] sm:$0xff] }
 0x5f9   :  { %738 = vrot.lane.b32.xlu0 %v3424_v39, %s3275_s27  ;;  %v116_v39 = vld [vmem:[%s3813_s5] sm:$0xff] }
 0x65c   :  { %v730_v35 = vpop.xlane.xlu0 %729 }
 0x65d   :  { %3201 = vrcp.f32 %v730_v35  ;;  %v129_v35 = vld [vmem:[%s3819_s11 + $0x8] sm:$0xff] }
 0x66a   :  { %v3202_v37 = vpop.eup %3201 }
 0x66b   :  { %v736_v40 = vmul.f32 %v3202_v37, %v3198_v25  ;;  %v2793_v37 = vld [vmem:[%s3818_s10] ss:$0 sm:$0xff] }
 0x66c   :  { %v733_v36 = vpop.xlane.xlu0 %732 }
 0x66d   :  { %3203 = vrcp.f32 %v733_v36  ;;  %v128_v36 = vld [vmem:[%s3819_s11] sm:$0xff] }
 0x670   :  { %v739_v38 = vpop.permute.xlu0 %738 }
 0x671   :  { %3007 = vmatpush3.msra.mxu0 %v739_v38 }
 0x672   :  { %3009 = vmatmul.mubr.msk.f32.vlgmr.msra.gmra.mxu0 %vm383_vm3, %v736_v40  ;;  %3016 = vmatprep.subr.mxu0 %v119_v43 }
 0x673   :  { %3017 = vmatpush3.msra.mxu0 %v119_v43 }
 0x674   :  { %3018 = vmatprep.subr.mxu0 %v118_v44 }
 0x675   :  { %3019 = vmatpush3.msra.mxu0 %v118_v44 }
 0x67a   :  { %v3204_v41 = vpop.eup %3203 }
 0x67b   :  { %v737_v42 = vmul.f32 %v3204_v41, %v3200_v29  ;;  %v132_v29 = vld [vmem:[%s3819_s11 + $0x20] sm:$0xff] }
 0x67d   :  { %3014 = vmatmul.mubr.msk.f32.vlgmr.msra.gmra.mxu1 %vm383_vm3, %v737_v42 }
 0x67e   :  { %3024 = vmatpush3.msra.mxu1 %v117_v32  ;;  %3027 = vmatprep.mubr.msk.f32.mxu1 %vm229_vm2, %v478_v12  ;;  %v130_v32 = vld [vmem:[%s3819_s11 + $0x10] sm:$0xff] }
 0x67f   :  { %3025 = vmatprep.subr.mxu1 %v116_v39 }
 0x680   :  { %3026 = vmatpush3.msra.mxu1 %v116_v39 }
 0x681   :  { %3028 = vmatmul.mubr.msk.f32.vlgmr.msra.gmra.mxu1 %vm229_vm2, %v554_v14  ;;  %3041 = vmatprep.subr.mxu1 %v135_v26 }
 0x682   :  { %3042 = vmatpush3.msra.mxu1 %v135_v26 }
 0x683   :  { %3043 = vmatprep.subr.mxu1 %v134_v27 }
 0x684   :  { %3044 = vmatpush3.msra.mxu1 %v134_v27 }
 0x685   :  { %3045 = vmatprep.subr.mxu1 %v133_v28 }
 0x686   :  { %3046 = vmatpush3.msra.mxu1 %v133_v28 }
 0x687   :  { %3047 = vmatprep.subr.mxu1 %v132_v29 }
 0x688   :  { %3048 = vmatpush3.msra.mxu1 %v132_v29  ;;  %v2800_v29 = vld [vmem:[%s3822_s14] ss:$0 sm:$0xff] }
 0x689   :  { %3049 = vmatprep.subr.mxu1 %v131_v30 }
 0x68a   :  { %3050 = vmatpush3.msra.mxu1 %v131_v30 }
 0x68b   :  { %3051 = vmatprep.subr.mxu1 %v130_v32 }
 0x68c   :  { %3052 = vmatpush3.msra.mxu1 %v130_v32 }
 0x68d   :  { %3053 = vmatprep.subr.mxu1 %v129_v35 }
 0x68e   :  { %3054 = vmatpush3.msra.mxu1 %v129_v35 }
 0x68f   :  { %3055 = vmatprep.subr.mxu1 %v128_v36 }
 0x690   :  { %3056 = vmatpush3.msra.mxu1 %v128_v36  ;;  %v2829_v36 = vld [vmem:[%s3812_s4 + $0x1] ss:$0 sm:$0xff] }
 0x691   :  { %3076 = vmatprep.subr.mxu1 %v3269_v34 }
 0x732   :  { %v810_v45 = vpop.f32.mrf.mxu0 }
 0x733   :  { %3020 = vmatprep.mubr.msk.f32.mxu0 %vm229_vm2, %v810_v45 }
 0x734   :  { %v3010_v46 = vpop.f32.mrf.mxu0 }
 0x73d   :  { %v886_v47 = vpop.f32.mrf.mxu1 }
 0x73e   :  { %3021 = vmatmul.mubr.msk.f32.vlgmr.msra.gmra.mxu0 %vm229_vm2, %v886_v47 }
 0x73f   :  { %v3015_v48 = vpop.f32.mrf.mxu1 }
 0x741   :  { %v3029_v49 = vpop.f32.mrf.mxu1 }
 0x743   :  { %v1043_v53 = vpop.f32.mrf.mxu1 }
 0x7fe   :  { %v3022_v51 = vpop.f32.mrf.mxu0 }
 0x7ff   :  { %v1049_v52 = vadd.f32 %v3029_v49, %v3022_v51 }
 0x800   :  { %v962_v54 = vpop.f32.mrf.mxu0 }
 0x801   :  { %v1059_v55 = vadd.f32 %v2790_v50, %v1049_v52  ;;  %v1044_v56 = vadd.f32 %v1043_v53, %v962_v54 }
 0x803   :  { %v1058_v57 = vadd.f32 %v2790_v50, %v1044_v56  ;;  %v1061_v58 = vadd.f32 %v1059_v55, %v3409_v33 }
 0x805   :  { %v1065_v59 = vsel %vm67_vm0, %v1061_v58, 0.0  ;;  %v1060_v60 = vadd.f32 %v1058_v57, %v3405_v31  ;;  %v126_v31 = vld [vmem:[%s3817_s9 + $0x18] sm:$0xff] }
 0x806   :  { %1066 = vadd.xlane.f32.xlu0 %v1065_v59  ;;  %3030 = vmatprep.subr.mxu0 %v126_v31 }
 0x807   :  { %v1062_v61 = vsel %vm67_vm0, %v1060_v60, 0.0  ;;  %3031 = vmatpush3.msra.mxu0 %v126_v31 }
 0x808   :  { %1063 = vadd.xlane.f32.xlu1 %v1062_v61  ;;  %3032 = vmatprep.subr.mxu0 %v125_v7 }
 0x809   :  { %3033 = vmatpush3.msra.mxu0 %v125_v7 }
 0x80a   :  { %3034 = vmatprep.subr.mxu0 %v124_v8 }
 0x80b   :  { %3035 = vmatpush3.msra.mxu0 %v124_v8 }
 0x80c   :  { %3036 = vmatprep.subr.mxu0 %v123_v9 }
 0x80d   :  { %3037 = vmatpush3.msra.mxu0 %v123_v9 }
 0x88f   :  { %v1067_v62 = vpop.xlane.xlu0 %1066 }
 0x890   :  { %v1069_v63 = vmul.f32 0.03125, %v1067_v62 }
 0x891   :  { %v1064_v0 = vpop.xlane.xlu1 %1063 }
 0x892   :  { %v1071_v1 = vsub.f32 %v1061_v58, %v1069_v63  ;;  %v1068_v2 = vmul.f32 0.03125, %v1064_v0 }
 0x894   :  { %v1070_v3 = vsub.f32 %v1060_v60, %v1068_v2  ;;  %v1073_v4 = vmul.f32 %v1071_v1, %v1071_v1  ;;  %v2796_v60 = vld [vmem:[%s3820_s12] ss:$0 sm:$0xff] }
 0x896   :  { %v1077_v5 = vsel %vm67_vm0, %v1073_v4, 0.0  ;;  %v1072_v6 = vmul.f32 %v1070_v3, %v1070_v3 }
 0x897   :  { %1078 = vadd.xlane.f32.xlu1 %v1077_v5 }
 0x898   :  { %v1074_v33 = vsel %vm67_vm0, %v1072_v6, 0.0 }
 0x899   :  { %1075 = vadd.xlane.f32.xlu0 %v1074_v33 }
 0x920   :  { %v1079_v10 = vpop.xlane.xlu1 %1078 }
 0x921   :  { %v1081_v11 = vmul.f32 0.03125, %v1079_v10 }
 0x922   :  { %v1076_v12 = vpop.xlane.xlu0 %1075 }
 0x923   :  { %v1083_v13 = vadd.f32 1e-12, %v1081_v11  ;;  %v1080_v14 = vmul.f32 0.03125, %v1076_v12 }
 0x925   :  { %3205 = vrsqrt.f32 %v1083_v13  ;;  %v1082_v15 = vadd.f32 1e-12, %v1080_v14  ;;  %v2804_v13 = vld [vmem:[%s3835_s23 + $0x38] sm:$0xff]  ;;  %v2803_v14 = vld [vmem:[%s3835_s23 + $0x30] sm:$0xff] }
 0x926   :  { %3060 = vmatprep.subr.mxu0 %v2804_v13 }
 0x927   :  { %3207 = vrsqrt.f32 %v1082_v15  ;;  %v2802_v15 = vld [vmem:[%s3835_s23 + $0x28] sm:$0xff] }
 0x932   :  { %v3206_v16 = vpop.eup %3205 }
 0x933   :  { %v1087_v18 = vmul.f32 %v3206_v16, %v1071_v1  ;;  %v2801_v16 = vld [vmem:[%s3835_s23 + $0x20] sm:$0xff] }
 0x934   :  { %v3208_v19 = vpop.eup %3207 }
 0x935   :  { %v1086_v20 = vmul.f32 %v3208_v19, %v1070_v3  ;;  %v1095_v21 = vmul.f32 %v2791_v17, %v1087_v18 }
 0x937   :  { %v1094_v23 = vmul.f32 %v2791_v17, %v1086_v20  ;;  %v1103_v25 = vadd.f32 %v2792_v22, %v1095_v21 }
 0x939   :  { %v3529_v24 = vadd.f32 %v2792_v22, %v1094_v23 }
 0x93b   :  { %3038 = vmatprep.mubr.msk.f32.mxu0 %vm67_vm0, %v3529_v24 }
 0x93c   :  { %3039 = vmatmul.mubr.msk.f32.vlgmr.msra.gmra.mxu0 %vm67_vm0, %v1103_v25 }
 0x93d   :  { %3061 = vmatpush3.msra.mxu0 %v2804_v13 }
 0x93e   :  { %3062 = vmatprep.subr.mxu0 %v2803_v14 }
 0x93f   :  { %3063 = vmatpush3.msra.mxu0 %v2803_v14 }
 0x940   :  { %3064 = vmatprep.subr.mxu0 %v2802_v15 }
 0x941   :  { %3065 = vmatpush3.msra.mxu0 %v2802_v15 }
 0x942   :  { %3066 = vmatprep.subr.mxu0 %v2801_v16 }
 0x943   :  { %3067 = vmatpush3.msra.mxu0 %v2801_v16 }
 0x944   :  { %3071 = vmatprep.subr.mxu0 %v3269_v34 }
 0x9fc   :  { %v3040_v38 = vpop.f32.mrf.mxu0 }
 0x9fd   :  { %v1188_v40 = vadd.f32 %v3040_v38, %v2793_v37 }
 0x9fe   :  { %v1182_v41 = vpop.f32.mrf.mxu0 }
 0x9ff   :  { %v1192_v42 = vmul.f32 %v1188_v40, %v1188_v40  ;;  %v1183_v39 = vadd.f32 %v2793_v37, %v1182_v41 }
 0xa01   :  { %v1194_v43 = vmul.f32 %v1192_v42, %v1188_v40  ;;  %v1191_v44 = vmul.f32 %v1183_v39, %v1183_v39 }
 0xa03   :  { %v1196_v45 = vmul.f32 0.044715, %v1194_v43  ;;  %v1193_v46 = vmul.f32 %v1191_v44, %v1183_v39 }
 0xa05   :  { %v1198_v47 = vadd.f32 %v1196_v45, %v1188_v40  ;;  %v1195_v48 = vmul.f32 0.044715, %v1193_v46 }
 0xa07   :  { %v1200_v49 = vmul.f32 0.7978846, %v1198_v47  ;;  %v1197_v50 = vadd.f32 %v1195_v48, %v1183_v39 }
 0xa09   :  { %3209 = vtanh.f32 %v1200_v49  ;;  %v1199_v51 = vmul.f32 0.7978846, %v1197_v50 }
 0xa0b   :  { %3211 = vtanh.f32 %v1199_v51 }
 0xa16   :  { %v3210_v52 = vpop.eup %3209 }
 0xa17   :  { %v1204_v53 = vadd.f32 1.0, %v3210_v52 }
 0xa18   :  { %v3212_v54 = vpop.eup %3211 }
 0xa19   :  { %v1203_v55 = vadd.f32 1.0, %v3212_v54  ;;  %v1206_v56 = vmul.f32 0.5, %v1204_v53 }
 0xa1b   :  { %v1205_v57 = vmul.f32 0.5, %v1203_v55  ;;  %v1208_v59 = vmul.f32 %v1206_v56, %v1188_v40 }
 0xa1d   :  { %v1207_v58 = vmul.f32 %v1205_v57, %v1183_v39 }
 0xa1f   :  { %3057 = vmatprep.mubr.msk.f32.mxu1 %vm1215_vm4, %v1207_v58 }
 0xa20   :  { %3058 = vmatmul.mubr.msk.f32.vlgmr.msra.gmra.mxu1 %vm1215_vm4, %v1208_v59 }
 0xa21   :  { %3078 = vmatprep.mubr.msk.f32.mxu1 %vm3270_vm1, %v3269_v34 }
 0xae0   :  { %v3059_v61 = vpop.f32.mrf.mxu1 }
 0xae1   :  { %v1294_v62 = vadd.f32 %v3059_v61, %v2796_v60 }
 0xae2   :  { %v1288_v63 = vpop.f32.mrf.mxu1 }
 0xae3   :  { %v1289_v0 = vadd.f32 %v2796_v60, %v1288_v63  ;;  %v1298_v1 = vadd.f32 %v1294_v62, %v1103_v25 }
 0xae5   :  { %v1302_v2 = vsel %vm67_vm0, %v1298_v1, 0.0  ;;  %v1297_v3 = vadd.f32 %v1289_v0, %v3529_v24  ;;  %v2799_v24 = vld [vmem:[%s3821_s13] ss:$0 sm:$0xff] }
 0xae6   :  { %1303 = vadd.xlane.f32.xlu1 %v1302_v2 }
 0xae7   :  { %v1299_v4 = vsel %vm67_vm0, %v1297_v3, 0.0 }
 0xae8   :  { %1300 = vadd.xlane.f32.xlu0 %v1299_v4 }
 0xb6f   :  { %v1304_v5 = vpop.xlane.xlu1 %1303 }
 0xb70   :  { %v1306_v6 = vmul.f32 0.03125, %v1304_v5 }
 0xb71   :  { %v1301_v33 = vpop.xlane.xlu0 %1300 }
 0xb72   :  { %v1308_v31 = vsub.f32 %v1298_v1, %v1306_v6  ;;  %v1305_v7 = vmul.f32 0.03125, %v1301_v33 }
 0xb74   :  { %v1307_v8 = vsub.f32 %v1297_v3, %v1305_v7  ;;  %v1310_v9 = vmul.f32 %v1308_v31, %v1308_v31 }
 0xb76   :  { %v1314_v10 = vsel %vm67_vm0, %v1310_v9, 0.0  ;;  %v1309_v11 = vmul.f32 %v1307_v8, %v1307_v8 }
 0xb77   :  { %1315 = vadd.xlane.f32.xlu1 %v1314_v10 }
 0xb78   :  { %v1311_v12 = vsel %vm67_vm0, %v1309_v11, 0.0 }
 0xb79   :  { %1312 = vadd.xlane.f32.xlu0 %v1311_v12 }
 0xc00   :  { %v1316_v17 = vpop.xlane.xlu1 %1315 }
 0xc01   :  { %v1318_v18 = vmul.f32 0.03125, %v1316_v17 }
 0xc02   :  { %v1313_v19 = vpop.xlane.xlu0 %1312 }
 0xc03   :  { %v1320_v20 = vadd.f32 1e-12, %v1318_v18  ;;  %v1317_v21 = vmul.f32 0.03125, %v1313_v19 }
 0xc05   :  { %3213 = vrsqrt.f32 %v1320_v20  ;;  %v1319_v22 = vadd.f32 1e-12, %v1317_v21 }
 0xc07   :  { %3215 = vrsqrt.f32 %v1319_v22 }
 0xc12   :  { %v3214_v23 = vpop.eup %3213 }
 0xc13   :  { %v1324_v25 = vmul.f32 %v3214_v23, %v1308_v31 }
 0xc14   :  { %v3216_v26 = vpop.eup %3215 }
 0xc15   :  { %v1323_v27 = vmul.f32 %v3216_v26, %v1307_v8  ;;  %v1332_v28 = vmul.f32 %v2799_v24, %v1324_v25 }
 0xc17   :  { %v1331_v30 = vmul.f32 %v2799_v24, %v1323_v27  ;;  %v3595_v35 = vadd.f32 %v2800_v29, %v1332_v28 }
 0xc19   :  { %v3593_v32 = vadd.f32 %v2800_v29, %v1331_v30  ;;  %v2807_v30 = vld [vmem:[%s3813_s5 + $0x28] sm:$0xff] }
 0xc1b   :  { %3068 = vmatprep.mubr.msk.f32.mxu0 %vm67_vm0, %v3593_v32 }
 0xc1c   :  { %3069 = vmatmul.mubr.msk.f32.vlgmr.msra.gmra.mxu0 %vm67_vm0, %v3595_v35 }
 0xc1d   :  { %3073 = vmatprep.mubr.msk.f32.mxu0 %vm3270_vm1, %v3269_v34 }
 0xcdc   :  { %v3070_v37 = vpop.f32.mrf.mxu0 }
 0xcdd   :  { %v3606_v38 = vadd.f32 %v3070_v37, %v2829_v36 }
 0xcde   :  { %v1459_v40 = vpop.f32.mrf.mxu0 }
 0xcdf   :  { %v3608_v41 = vadd.f32 %v2829_v36, %v1459_v40  ;;  %1546 = vrot.lane.b32.xlu1 %v3606_v38, %s3271_s24 }
 0xce1   :  { %1469 = vrot.lane.b32.xlu0 %v3608_v41, %s3271_s24 }
 0xd51   :  { %v1547_v42 = vpop.permute.xlu1 %1546 }
 0xd52   :  { %3077 = vmatpush3.xpose.msk.msra.mxu1 %vm229_vm2, %v1547_v42 }
 0xd53   :  { %v1470_v39 = vpop.permute.xlu0 %1469  ;;  %3086 = vmatprep.subr.mxu1 %v3269_v34 }
 0xd54   :  { %3072 = vmatpush3.xpose.msk.msra.mxu0 %vm229_vm2, %v1470_v39  ;;  %v2806_v39 = vld [vmem:[%s3813_s5 + $0x20] sm:$0xff] }
 0xd55   :  { %3079 = vmatmul.mubr.msk.f32.vlgmr.msra.gmra.mxu1 %vm229_vm2, %v3606_v38  ;;  %3081 = vmatprep.subr.mxu0 %v3269_v34 }
 0xd56   :  { %3088 = vmatprep.mubr.msk.f32.mxu1 %vm3270_vm1, %v3269_v34 }
 0xd57   :  { %3074 = vmatmul.mubr.msk.f32.vlgmr.msra.gmra.mxu0 %vm229_vm2, %v3608_v41 }
 0xd58   :  { %3083 = vmatprep.mubr.msk.f32.mxu0 %vm3270_vm1, %v3269_v34 }
 0xe15   :  { %v1618_v43 = vpop.f32.mrf.mxu1 }
 0xe16   :  { %v1623_v44 = vmul.f32 0.25, %v1618_v43 }
 0xe17   :  { %v1541_v45 = vpop.f32.mrf.mxu0  ;;  %v3080_v46 = vpop.f32.mrf.mxu1 }
 0xe18   :  { %v1622_v47 = vmul.f32 0.25, %v1541_v45  ;;  %v1627_v48 = vsel %vm383_vm3, %v1623_v44, -inf  ;;  %v2808_v45 = vld [vmem:[%s3813_s5 + $0x30] sm:$0xff] }
 0xe19   :  { %1628 = vmax.xlane.f32.xlu0 %v1627_v48  ;;  %v3075_v49 = vpop.f32.mrf.mxu0 }
 0xe1a   :  { %v1624_v50 = vsel %vm383_vm3, %v1622_v47, -inf }
 0xe1b   :  { %1625 = vmax.xlane.f32.xlu1 %v1624_v50 }
 0xea2   :  { %v1629_v51 = vpop.xlane.xlu0 %1628 }
 0xea3   :  { %v1631_v52 = vsub.f32 %v1623_v44, %v1629_v51  ;;  %v2809_v44 = vld [vmem:[%s3813_s5 + $0x38] sm:$0xff]  ;;  %v2848_v51 = vld [vmem:[%s3814_s6 + $0x1] ss:$0 sm:$0xff] }
 0xea4   :  { %v1626_v53 = vpop.xlane.xlu1 %1625 }
 0xea5   :  { %v1634_v54 = vmul.f32 1.442695, %v1631_v52  ;;  %v1630_v55 = vsub.f32 %v1622_v47, %v1626_v53 }
 0xea7   :  { %3217 = vpow2.f32 %v1634_v54  ;;  %v1632_v56 = vmul.f32 1.442695, %v1630_v55 }
 0xea9   :  { %3219 = vpow2.f32 %v1632_v56 }
 0xeb4   :  { %v3218_v57 = vpop.eup %3217 }
 0xeb5   :  { %v1639_v58 = vsel %vm383_vm3, %v3218_v57, 0.0 }
 0xeb6   :  { %v3220_v59 = vpop.eup %3219  ;;  %1640 = vadd.xlane.f32.xlu1 %v1639_v58 }
 0xeb7   :  { %v1636_v60 = vsel %vm383_vm3, %v3220_v59, 0.0 }
 0xeb8   :  { %1637 = vadd.xlane.f32.xlu0 %v1636_v60 }
 0xec7   :  { %1722 = vrot.lane.b32.xlu1 %v3606_v38, %s3272_s25 }
 0xecb   :  { %1800 = vrot.lane.b32.xlu1 %v3608_v41, %s3273_s3 }
 0xece   :  { %1646 = vrot.lane.b32.xlu0 %v3608_v41, %s3272_s25 }
 0xecf   :  { %1878 = vrot.lane.b32.xlu1 %v3606_v38, %s3273_s3 }
 0xed2   :  { %1798 = vrot.lane.b32.xlu0 %v3608_v41, %s3274_s26 }
 0xed3   :  { %1876 = vrot.lane.b32.xlu1 %v3606_v38, %s3274_s26 }
 0xf3f   :  { %v1641_v61 = vpop.xlane.xlu1 %1640 }
 0xf40   :  { %3221 = vrcp.f32 %v1641_v61 }
 0xf41   :  { %v1638_v62 = vpop.xlane.xlu0 %1637 }
 0xf42   :  { %3223 = vrcp.f32 %v1638_v62 }
 0xf43   :  { %v1723_v63 = vpop.permute.xlu1 %1722 }
 0xf44   :  { %3087 = vmatpush3.msra.mxu1 %v1723_v63 }
 0xf45   :  { %v1647_v0 = vpop.permute.xlu0 %1646  ;;  %3096 = vmatprep.subr.mxu1 %v3269_v34 }
 0xf46   :  { %3082 = vmatpush3.msra.mxu0 %v1647_v0 }
 0xf47   :  { %v1801_v1 = vpop.permute.xlu1 %1800  ;;  %3091 = vmatprep.subr.mxu0 %v3269_v34 }
 0xf49   :  { %v1799_v31 = vpop.permute.xlu0 %1798 }
 0xf4b   :  { %v1879_v3 = vpop.permute.xlu1 %1878 }
 0xf4d   :  { %v3222_v2 = vpop.eup %3221 }
 0xf4e   :  { %v1645_v4 = vmul.f32 %v3222_v2, %v3218_v57 }
 0xf4f   :  { %v3224_v5 = vpop.eup %3223  ;;  %v1877_v33 = vpop.permute.xlu1 %1876 }
 0xf50   :  { %3089 = vmatmul.mubr.msk.f32.vlgmr.msra.gmra.mxu1 %vm383_vm3, %v1645_v4  ;;  %v1644_v6 = vmul.f32 %v3224_v5, %v3220_v59 }
 0xf51   :  { %3097 = vmatpush3.xpose.msk.msra.mxu1 %vm229_vm2, %v1879_v3  ;;  %3098 = vmatprep.mubr.msk.f32.mxu1 %vm3270_vm1, %v3269_v34 }
 0xf52   :  { %3084 = vmatmul.mubr.msk.f32.vlgmr.msra.gmra.mxu0 %vm383_vm3, %v1644_v6  ;;  %3106 = vmatprep.subr.mxu1 %v3269_v34 }
 0xf53   :  { %3092 = vmatpush3.xpose.msk.msra.mxu0 %vm229_vm2, %v1801_v1  ;;  %3093 = vmatprep.mubr.msk.f32.mxu0 %vm3270_vm1, %v3269_v34 }
 0xf54   :  { %3099 = vmatmul.mubr.msk.f32.vlgmr.msra.gmra.mxu1 %vm229_vm2, %v1877_v33  ;;  %3101 = vmatprep.subr.mxu0 %v3269_v34 }
 0xf55   :  { %3108 = vmatprep.mubr.msk.f32.mxu1 %vm3270_vm1, %v3269_v34 }
 0xf56   :  { %3094 = vmatmul.mubr.msk.f32.vlgmr.msra.gmra.mxu0 %vm229_vm2, %v1799_v31  ;;  %v2815_v31 = vld [vmem:[%s3817_s9 + $0x30] sm:$0xff] }
 0xf57   :  { %3103 = vmatprep.mubr.msk.f32.mxu0 %vm3270_vm1, %v3269_v34 }
0x1010   :  { %v1794_v7 = vpop.f32.mrf.mxu1 }
0x1012   :  { %v1718_v8 = vpop.f32.mrf.mxu0  ;;  %v3090_v9 = vpop.f32.mrf.mxu1 }
0x1014   :  { %v3085_v10 = vpop.f32.mrf.mxu0  ;;  %v1950_v11 = vpop.f32.mrf.mxu1 }
0x1015   :  { %v1955_v12 = vmul.f32 0.25, %v1950_v11 }
0x1016   :  { %v1872_v13 = vpop.f32.mrf.mxu0  ;;  %v3100_v14 = vpop.f32.mrf.mxu1 }
0x1017   :  { %v1954_v15 = vmul.f32 0.25, %v1872_v13  ;;  %v1959_v16 = vsel %vm383_vm3, %v1955_v12, -inf }
0x1018   :  { %1960 = vmax.xlane.f32.xlu1 %v1959_v16  ;;  %v3095_v17 = vpop.f32.mrf.mxu0  ;;  %v2849_v16 = vld [vmem:[%s3815_s7 + $0x1] ss:$0 sm:$0xff] }
0x1019   :  { %v1956_v18 = vsel %vm383_vm3, %v1954_v15, -inf }
0x101a   :  { %1957 = vmax.xlane.f32.xlu0 %v1956_v18 }
0x1029   :  { %2054 = vrot.lane.b32.xlu1 %v3606_v38, %s3275_s27 }
0x10a1   :  { %v1961_v19 = vpop.xlane.xlu1 %1960 }
0x10a2   :  { %v1963_v20 = vsub.f32 %v1955_v12, %v1961_v19 }
0x10a3   :  { %v1958_v21 = vpop.xlane.xlu0 %1957 }
0x10a4   :  { %v1966_v22 = vmul.f32 1.442695, %v1963_v20  ;;  %v1962_v23 = vsub.f32 %v1954_v15, %v1958_v21  ;;  %v2850_v21 = vld [vmem:[%s3816_s8 + $0x1] ss:$0 sm:$0xff] }
0x10a5   :  { %v2055_v24 = vpop.permute.xlu1 %2054 }
0x10a6   :  { %3225 = vpow2.f32 %v1966_v22  ;;  %v1964_v25 = vmul.f32 1.442695, %v1962_v23  ;;  %3107 = vmatpush3.msra.mxu1 %v2055_v24 }
0x10a7   :  { %3118 = vmatprep.subr.mxu1 %v2807_v30 }
0x10a8   :  { %3227 = vpow2.f32 %v1964_v25  ;;  %v2825_v25 = vld [vmem:[%s3819_s11 + $0x78] sm:$0xff] }
0x10b3   :  { %v3226_v26 = vpop.eup %3225 }
0x10b4   :  { %v1971_v27 = vsel %vm383_vm3, %v3226_v26, 0.0 }
0x10b5   :  { %v3228_v28 = vpop.eup %3227  ;;  %1972 = vadd.xlane.f32.xlu0 %v1971_v27  ;;  %v2823_v27 = vld [vmem:[%s3819_s11 + $0x68] sm:$0xff] }
0x10b6   :  { %v1968_v29 = vsel %vm383_vm3, %v3228_v28, 0.0 }
0x10b9   :  { %1969 = vadd.xlane.f32.xlu0 %v1968_v29  ;;  %v2821_v29 = vld [vmem:[%s3819_s11 + $0x58] sm:$0xff] }
0x10cf   :  { %1978 = vrot.lane.b32.xlu0 %v3608_v41, %s3275_s27 }
0x113e   :  { %v1973_v36 = vpop.xlane.xlu0 %1972 }
0x113f   :  { %3229 = vrcp.f32 %v1973_v36  ;;  %v2819_v36 = vld [vmem:[%s3819_s11 + $0x48] sm:$0xff] }
0x1142   :  { %v1970_v37 = vpop.xlane.xlu0 %1969 }
0x1143   :  { %3231 = vrcp.f32 %v1970_v37  ;;  %v2818_v37 = vld [vmem:[%s3819_s11 + $0x40] sm:$0xff] }
0x1146   :  { %v1979_v38 = vpop.permute.xlu0 %1978 }
0x1147   :  { %3102 = vmatpush3.msra.mxu0 %v1979_v38  ;;  %v2851_v38 = vld [vmem:[%s3818_s10 + $0x1] ss:$0 sm:$0xff] }
0x1148   :  { %3111 = vmatprep.subr.mxu0 %v2809_v44 }
0x114c   :  { %v3230_v40 = vpop.eup %3229 }
0x114d   :  { %v1977_v42 = vmul.f32 %v3230_v40, %v3226_v26  ;;  %v2824_v26 = vld [vmem:[%s3819_s11 + $0x70] sm:$0xff] }
0x114f   :  { %3109 = vmatmul.mubr.msk.f32.vlgmr.msra.gmra.mxu1 %vm383_vm3, %v1977_v42 }
0x1150   :  { %v3232_v41 = vpop.eup %3231  ;;  %3119 = vmatpush3.msra.mxu1 %v2807_v30  ;;  %3122 = vmatprep.mubr.msk.f32.mxu1 %vm229_vm2, %v1718_v8  ;;  %v2813_v8 = vld [vmem:[%s3817_s9 + $0x20] sm:$0xff]  ;;  %v2820_v30 = vld [vmem:[%s3819_s11 + $0x50] sm:$0xff] }
0x1151   :  { %3120 = vmatprep.subr.mxu1 %v2806_v39  ;;  %v1976_v43 = vmul.f32 %v3232_v41, %v3228_v28  ;;  %v2822_v28 = vld [vmem:[%s3819_s11 + $0x60] sm:$0xff] }
0x1152   :  { %3121 = vmatpush3.msra.mxu1 %v2806_v39 }
0x1153   :  { %3104 = vmatmul.mubr.msk.f32.vlgmr.msra.gmra.mxu0 %vm383_vm3, %v1976_v43  ;;  %3123 = vmatmul.mubr.msk.f32.vlgmr.msra.gmra.mxu1 %vm229_vm2, %v1794_v7  ;;  %v2814_v7 = vld [vmem:[%s3817_s9 + $0x28] sm:$0xff] }
0x1154   :  { %3112 = vmatpush3.msra.mxu0 %v2809_v44  ;;  %3136 = vmatprep.subr.mxu1 %v2825_v25 }
0x1155   :  { %3113 = vmatprep.subr.mxu0 %v2808_v45  ;;  %3137 = vmatpush3.msra.mxu1 %v2825_v25 }
0x1156   :  { %3114 = vmatpush3.msra.mxu0 %v2808_v45  ;;  %3138 = vmatprep.subr.mxu1 %v2824_v26 }
0x1157   :  { %3139 = vmatpush3.msra.mxu1 %v2824_v26  ;;  %v2858_v26 = vld [vmem:[%s3822_s14 + $0x1] ss:$0 sm:$0xff] }
0x1158   :  { %3140 = vmatprep.subr.mxu1 %v2823_v27 }
0x1159   :  { %3141 = vmatpush3.msra.mxu1 %v2823_v27 }
0x115a   :  { %3142 = vmatprep.subr.mxu1 %v2822_v28 }
0x115b   :  { %3143 = vmatpush3.msra.mxu1 %v2822_v28 }
0x115c   :  { %3144 = vmatprep.subr.mxu1 %v2821_v29 }
0x115d   :  { %3145 = vmatpush3.msra.mxu1 %v2821_v29 }
0x115e   :  { %3146 = vmatprep.subr.mxu1 %v2820_v30 }
0x115f   :  { %3147 = vmatpush3.msra.mxu1 %v2820_v30 }
0x1160   :  { %3148 = vmatprep.subr.mxu1 %v2819_v36 }
0x1161   :  { %3149 = vmatpush3.msra.mxu1 %v2819_v36 }
0x1162   :  { %3150 = vmatprep.subr.mxu1 %v2818_v37 }
0x1163   :  { %3151 = vmatpush3.msra.mxu1 %v2818_v37 }
0x120f   :  { %v2126_v46 = vpop.f32.mrf.mxu1 }
0x1211   :  { %v3110_v47 = vpop.f32.mrf.mxu1 }
0x1213   :  { %v2050_v48 = vpop.f32.mrf.mxu0  ;;  %v3124_v50 = vpop.f32.mrf.mxu1 }
0x1214   :  { %3115 = vmatprep.mubr.msk.f32.mxu0 %vm229_vm2, %v2050_v48 }
0x1215   :  { %v3105_v49 = vpop.f32.mrf.mxu0  ;;  %3116 = vmatmul.mubr.msk.f32.vlgmr.msra.gmra.mxu0 %vm229_vm2, %v2126_v46  ;;  %v2283_v54 = vpop.f32.mrf.mxu1 }
0x12d5   :  { %v3117_v52 = vpop.f32.mrf.mxu0 }
0x12d6   :  { %v2289_v53 = vadd.f32 %v3124_v50, %v3117_v52 }
0x12d7   :  { %v2202_v55 = vpop.f32.mrf.mxu0 }
0x12d8   :  { %v2299_v56 = vadd.f32 %v2848_v51, %v2289_v53  ;;  %v2284_v57 = vadd.f32 %v2283_v54, %v2202_v55 }
0x12da   :  { %v2298_v58 = vadd.f32 %v2848_v51, %v2284_v57  ;;  %v2301_v59 = vadd.f32 %v2299_v56, %v3595_v35 }
0x12dc   :  { %v2305_v60 = vsel %vm67_vm0, %v2301_v59, 0.0  ;;  %v2300_v61 = vadd.f32 %v2298_v58, %v3593_v32  ;;  %v2816_v32 = vld [vmem:[%s3817_s9 + $0x38] sm:$0xff] }
0x12dd   :  { %2306 = vadd.xlane.f32.xlu0 %v2305_v60  ;;  %3125 = vmatprep.subr.mxu0 %v2816_v32 }
0x12de   :  { %v2302_v62 = vsel %vm67_vm0, %v2300_v61, 0.0  ;;  %3126 = vmatpush3.msra.mxu0 %v2816_v32 }
0x12df   :  { %2303 = vadd.xlane.f32.xlu1 %v2302_v62  ;;  %3127 = vmatprep.subr.mxu0 %v2815_v31 }
0x12e0   :  { %3128 = vmatpush3.msra.mxu0 %v2815_v31 }
0x12e1   :  { %3129 = vmatprep.subr.mxu0 %v2814_v7 }
0x12e2   :  { %3130 = vmatpush3.msra.mxu0 %v2814_v7 }
0x12e3   :  { %3131 = vmatprep.subr.mxu0 %v2813_v8 }
0x12e4   :  { %3132 = vmatpush3.msra.mxu0 %v2813_v8 }
0x12e5   :  { %3155 = vmatprep.subr.mxu0 %v3269_v34 }
0x1366   :  { %v2307_v63 = vpop.xlane.xlu0 %2306 }
0x1367   :  { %v2309_v0 = vmul.f32 0.03125, %v2307_v63 }
0x1368   :  { %v2304_v1 = vpop.xlane.xlu1 %2303 }
0x1369   :  { %v2311_v2 = vsub.f32 %v2301_v59, %v2309_v0  ;;  %v2308_v3 = vmul.f32 0.03125, %v2304_v1 }
0x136b   :  { %v2310_v4 = vsub.f32 %v2300_v61, %v2308_v3  ;;  %v2313_v5 = vmul.f32 %v2311_v2, %v2311_v2  ;;  %v2854_v61 = vld [vmem:[%s3820_s12 + $0x1] ss:$0 sm:$0xff] }
0x136d   :  { %v2317_v6 = vsel %vm67_vm0, %v2313_v5, 0.0  ;;  %v2312_v33 = vmul.f32 %v2310_v4, %v2310_v4 }
0x136e   :  { %2318 = vadd.xlane.f32.xlu1 %v2317_v6 }
0x136f   :  { %v2314_v35 = vsel %vm67_vm0, %v2312_v33, 0.0 }
0x1370   :  { %2315 = vadd.xlane.f32.xlu0 %v2314_v35 }
0x13f7   :  { %v2319_v9 = vpop.xlane.xlu1 %2318 }
0x13f8   :  { %v2321_v10 = vmul.f32 0.03125, %v2319_v9 }
0x13f9   :  { %v2316_v11 = vpop.xlane.xlu0 %2315 }
0x13fa   :  { %v2323_v12 = vadd.f32 1e-12, %v2321_v10  ;;  %v2320_v13 = vmul.f32 0.03125, %v2316_v11 }
0x13fc   :  { %3233 = vrsqrt.f32 %v2323_v12  ;;  %v2322_v14 = vadd.f32 1e-12, %v2320_v13  ;;  %v2588_v12 = vld [vmem:[%s3823_s15 + $0x18] sm:$0xff]  ;;  %v2587_v13 = vld [vmem:[%s3823_s15 + $0x10] sm:$0xff] }
0x13fe   :  { %3235 = vrsqrt.f32 %v2322_v14  ;;  %v2586_v14 = vld [vmem:[%s3823_s15 + $0x8] sm:$0xff] }
0x1409   :  { %v3234_v15 = vpop.eup %3233 }
0x140a   :  { %v2327_v17 = vmul.f32 %v3234_v15, %v2311_v2  ;;  %v2585_v15 = vld [vmem:[%s3823_s15] sm:$0xff] }
0x140b   :  { %v3236_v18 = vpop.eup %3235 }
0x140c   :  { %v2326_v19 = vmul.f32 %v3236_v18, %v2310_v4  ;;  %v2335_v20 = vmul.f32 %v2849_v16, %v2327_v17 }
0x140e   :  { %v2334_v22 = vmul.f32 %v2849_v16, %v2326_v19  ;;  %v2343_v24 = vadd.f32 %v2850_v21, %v2335_v20 }
0x1410   :  { %v3714_v23 = vadd.f32 %v2850_v21, %v2334_v22 }
0x1412   :  { %3133 = vmatprep.mubr.msk.f32.mxu0 %vm67_vm0, %v3714_v23 }
0x1413   :  { %3134 = vmatmul.mubr.msk.f32.vlgmr.msra.gmra.mxu0 %vm67_vm0, %v2343_v24 }
0x1414   :  { %3163 = vmatprep.mubr.msk.f32.mxu0 %vm3270_vm1, %v3269_v34  ;;  %3156 = vmatpush3.msra.mxu0 %v2588_v12 }
0x1415   :  { %3157 = vmatprep.subr.mxu0 %v3269_v34 }
0x1416   :  { %3158 = vmatpush3.msra.mxu0 %v2587_v13 }
0x1417   :  { %3159 = vmatprep.subr.mxu0 %v3269_v34 }
0x1418   :  { %3160 = vmatpush3.msra.mxu0 %v2586_v14 }
0x1419   :  { %3161 = vmatprep.subr.mxu0 %v3269_v34 }
0x141a   :  { %3162 = vmatpush3.msra.mxu0 %v2585_v15 }
0x141b   :  { %3166 = vmatprep.subr.mxu0 %v3269_v34 }
0x14d3   :  { %v3135_v40 = vpop.f32.mrf.mxu0 }
0x14d4   :  { %v2428_v42 = vadd.f32 %v3135_v40, %v2851_v38  ;;  %v2673_v40 = vld [vmem:[%s3825_s17 + $0x18] sm:$0xff] }
0x14d5   :  { %v2422_v39 = vpop.f32.mrf.mxu0 }
0x14d6   :  { %v2432_v41 = vmul.f32 %v2428_v42, %v2428_v42  ;;  %v2423_v43 = vadd.f32 %v2851_v38, %v2422_v39  ;;  %v2671_v39 = vld [vmem:[%s3825_s17 + $0x8] sm:$0xff] }
0x14d8   :  { %v2434_v44 = vmul.f32 %v2432_v41, %v2428_v42  ;;  %v2431_v45 = vmul.f32 %v2423_v43, %v2423_v43  ;;  %v2670_v41 = vld [vmem:[%s3825_s17] sm:$0xff] }
0x14da   :  { %v2436_v46 = vmul.f32 0.044715, %v2434_v44  ;;  %v2433_v47 = vmul.f32 %v2431_v45, %v2423_v43 }
0x14dc   :  { %v2438_v48 = vadd.f32 %v2436_v46, %v2428_v42  ;;  %v2435_v49 = vmul.f32 0.044715, %v2433_v47 }
0x14de   :  { %v2440_v50 = vmul.f32 0.7978846, %v2438_v48  ;;  %v2437_v51 = vadd.f32 %v2435_v49, %v2423_v43  ;;  %v2861_v48 = vld [vmem:[%s3826_s18] ss:$0 sm:$0xff] }
0x14e0   :  { %3237 = vtanh.f32 %v2440_v50  ;;  %v2439_v52 = vmul.f32 0.7978846, %v2437_v51 }
0x14e2   :  { %3239 = vtanh.f32 %v2439_v52 }
0x14ed   :  { %v3238_v53 = vpop.eup %3237 }
0x14ee   :  { %v2444_v54 = vadd.f32 1.0, %v3238_v53 }
0x14ef   :  { %v3240_v55 = vpop.eup %3239 }
0x14f0   :  { %v2443_v56 = vadd.f32 1.0, %v3240_v55  ;;  %v2446_v57 = vmul.f32 0.5, %v2444_v54 }
0x14f2   :  { %v2445_v58 = vmul.f32 0.5, %v2443_v56  ;;  %v2448_v60 = vmul.f32 %v2446_v57, %v2428_v42  ;;  %v2672_v42 = vld [vmem:[%s3825_s17 + $0x10] sm:$0xff]  ;;  %s3276_s17 = smov [#allocation2]  }
0x14f3   :  { %s2761_s4 = sshll.u32 %s3276_s17, 4  ;;  %s2762_s4 = int_to_ptr.vmem [resolvable:$true] %s2761_s4 }
0x14f4   :  { %v2447_v59 = vmul.f32 %v2445_v58, %v2423_v43  ;;  %v2859_v43 = vld [vmem:[%s3824_s16] ss:$0 sm:$0xff]  ;;  %s3247_s10 = scalar_lea.vmem %s2762_s4, 32  ;;  %p3252_p1 = scmp.lt.s32.totalorder %s2762_s4, %s2762_s4 }
0x14f5   :  { %p3248_p0 = scmp.ne.s32.totalorder %s2762_s4, %s3247_s10  ;;  %p3253_p2 = scmp.lt.s32.totalorder %s3247_s10, %s3247_s10 }
0x14f6   :  { %3152 = vmatprep.mubr.msk.f32.mxu1 %vm1215_vm4, %v2447_v59 }
0x14f7   :  { %3153 = vmatmul.mubr.msk.f32.vlgmr.msra.gmra.mxu1 %vm1215_vm4, %v2448_v60  ;;  %p3254_p3 = por %p3253_p2, %p3252_p1 }
0x14f9   :  { %p3255_p4 = pnand %p3254_p3, %p3248_p0 }
0x15b7   :  { %v3154_v62 = vpop.f32.mrf.mxu1 }
0x15b8   :  { %v2533_v63 = vadd.f32 %v3154_v62, %v2854_v61 }
0x15b9   :  { %v2527_v0 = vpop.f32.mrf.mxu1 }
0x15ba   :  { %v2528_v1 = vadd.f32 %v2854_v61, %v2527_v0  ;;  %v2537_v2 = vadd.f32 %v2533_v63, %v2343_v24 }
0x15bc   :  { %v2541_v3 = vsel %vm67_vm0, %v2537_v2, 0.0  ;;  %v2536_v4 = vadd.f32 %v2528_v1, %v3714_v23  ;;  %v2857_v23 = vld [vmem:[%s3821_s13 + $0x1] ss:$0 sm:$0xff] }
0x15bd   :  { %2542 = vadd.xlane.f32.xlu0 %v2541_v3 }
0x15be   :  { %v2538_v5 = vsel %vm67_vm0, %v2536_v4, 0.0 }
0x15bf   :  { %2539 = vadd.xlane.f32.xlu1 %v2538_v5 }
0x1646   :  { %v2543_v6 = vpop.xlane.xlu0 %2542 }
0x1647   :  { %v2545_v33 = vmul.f32 0.03125, %v2543_v6 }
0x1648   :  { %v2540_v35 = vpop.xlane.xlu1 %2539 }
0x1649   :  { %v2547_v32 = vsub.f32 %v2537_v2, %v2545_v33  ;;  %v2544_v31 = vmul.f32 0.03125, %v2540_v35 }
0x164b   :  { %v2546_v7 = vsub.f32 %v2536_v4, %v2544_v31  ;;  %v2549_v8 = vmul.f32 %v2547_v32, %v2547_v32 }
0x164d   :  { %v2553_v9 = vsel %vm67_vm0, %v2549_v8, 0.0  ;;  %v2548_v10 = vmul.f32 %v2546_v7, %v2546_v7 }
0x164e   :  { %2554 = vadd.xlane.f32.xlu0 %v2553_v9 }
0x164f   :  { %v2550_v11 = vsel %vm67_vm0, %v2548_v10, 0.0 }
0x1650   :  { %2551 = vadd.xlane.f32.xlu1 %v2550_v11 }
0x16d7   :  { %v2555_v16 = vpop.xlane.xlu0 %2554 }
0x16d8   :  { %v2557_v17 = vmul.f32 0.03125, %v2555_v16 }
0x16d9   :  { %v2552_v18 = vpop.xlane.xlu1 %2551 }
0x16da   :  { %v2559_v19 = vadd.f32 1e-12, %v2557_v17  ;;  %v2556_v20 = vmul.f32 0.03125, %v2552_v18 }
0x16dc   :  { %3241 = vrsqrt.f32 %v2559_v19  ;;  %v2558_v21 = vadd.f32 1e-12, %v2556_v20 }
0x16de   :  { %3243 = vrsqrt.f32 %v2558_v21 }
0x16e9   :  { %v3242_v22 = vpop.eup %3241 }
0x16ea   :  { %v2563_v24 = vmul.f32 %v3242_v22, %v2547_v32 }
0x16eb   :  { %v3244_v25 = vpop.eup %3243 }
0x16ec   :  { %v2562_v27 = vmul.f32 %v3244_v25, %v2546_v7  ;;  %v2571_v28 = vmul.f32 %v2857_v23, %v2563_v24 }
0x16ee   :  { %v2570_v29 = vmul.f32 %v2857_v23, %v2562_v27  ;;  %v2579_v30 = vadd.f32 %v2858_v26, %v2571_v28 }
0x16f0   :  { %v2578_v36 = vadd.f32 %v2858_v26, %v2570_v29  ;;  %v2581_v37 = vrot.slane %v2579_v30, 7 }
0x16f2   :  { %v2584_v38 = vsel %vm2583_vm5, %v2578_v36, %v2581_v37 }
0x16f3   :  { %3164 = vmatmul.mubr.msk.f32.vlgmr.msra.gmra.mxu0 %vm67_vm0, %v2584_v38 }
0x16f4   :  { %3174 = vmatprep.mubr.msk.f32.mxu0 %vm3270_vm1, %v3269_v34  ;;  %3167 = vmatpush3.msra.mxu0 %v2673_v40 }
0x16f5   :  { %3168 = vmatprep.subr.mxu0 %v3269_v34 }
0x16f6   :  { %3169 = vmatpush3.msra.mxu0 %v2672_v42 }
0x16f7   :  { %3170 = vmatprep.subr.mxu0 %v3269_v34 }
0x16f8   :  { %3171 = vmatpush3.msra.mxu0 %v2671_v39 }
0x16f9   :  { %3172 = vmatprep.subr.mxu0 %v3269_v34 }
0x16fa   :  { %3173 = vmatpush3.msra.mxu0 %v2670_v41 }
0x17b3   :  { %v2665_v44 = vpop.f32.mrf.mxu0 }
0x17b4   :  { %v2666_v45 = vadd.f32 %v2859_v43, %v2665_v44 }
0x17b5   :  { %v3165_v46 = vpop.f32.mrf.mxu0 }
0x17b6   :  { %3245 = vtanh.f32 %v2666_v45 }
0x17c3   :  { %v3246_v47 = vpop.eup %3245 }
0x17c4   :  { %3175 = vmatmul.mubr.msk.f32.vlgmr.msra.gmra.mxu0 %vm67_vm0, %v3246_v47 }
0x1884   :  { %v2750_v49 = vpop.f32.mrf.mxu0 }
0x1885   :  { %v2751_v34 = vadd.f32 %v2861_v48, %v2750_v49 }
0x1886   :  { %v3176_v50 = vpop.f32.mrf.mxu0 }
0x1887   :  { %2754 = vst [vmem:[#allocation2] sm:$0x3] %v2751_v34 }
0x1888   :  { %3258 = shalt.err (!%p3255_p4)
}
0x1889   :  { %2764 = dma.vmem_to_hbm [thread:$0]  %s2762_s4, 32, %s3827_s19, [#allocation3]  }
0x188a   :  { %3267 = dma.done.wait [#allocation3], 32  }
0x188b   :  { %3268 = vsyncadd [#allocation3], 4294967264 }
0x188c   :  { %2768 = vsyncpa [#allocation3], 1 }

</bundles_post_ra>
